<compile_context>
chip_gen: v5e
topology: v5e:2x2
jax: 0.10.0
libtpu: 0.0.40
codegen_flags: <defaults>
</compile_context>

<pallas_src>
import functools
import math

import jax
import jax.numpy as jnp
from jax.experimental import pallas as pl
from jax.experimental.pallas import tpu as pltpu


_VMEM_LIMIT = 32 * 1024 * 1024           # safe scoped-VMEM cap on every generation
_FUSED_RESIDENT_BUDGET = 16 * 1024 * 1024  # fused path only when well under this


# --------------------------------------------------------------------------------
# helpers
# --------------------------------------------------------------------------------

def _round_up(x, m):
    return ((x + m - 1) // m) * m


def _pad2(x, rows, cols):
    return jnp.pad(x, ((0, rows - x.shape[0]), (0, cols - x.shape[1])))


# --------------------------------------------------------------------------------
# shared in-kernel math: GlobalAttention pooling + mean_layer (all f32)
# --------------------------------------------------------------------------------

def _attention_pool_project(h2, seg, seg_t, gw_row, wmu, bmu, *, hidden_dim):
    """h2:[Np,Hp] f32, seg:[G8,Np] f32, seg_t:[Np,GL] f32, gw_row:[1,Hp] f32."""
    n_p, h_p = h2.shape
    # gate_nn(x): VPU multiply + lane reduce (gate bias cancels in the softmax).
    gate = jnp.sum(h2 * gw_row, axis=-1, keepdims=True)               # [Np, 1]
    # Per-graph max (robust shift): spread node gates into their graph column,
    # reduce over the node (sublane) axis.  Padded nodes/graphs stay masked out.
    gate_cols = jnp.broadcast_to(gate, seg_t.shape)                   # [Np, GL]
    masked = jnp.where(seg_t > 0.0, gate_cols, -1e30)
    m_g = jnp.max(masked, axis=0, keepdims=True)                      # [1, GL]
    shift = jnp.sum(seg_t * m_g, axis=-1, keepdims=True)              # [Np, 1]
    w = jnp.exp(gate - shift)                                         # <=1 for real nodes
    # Carry the softmax denominator in the (zero-padded) lane `hidden_dim` of h2.
    den_col = jax.lax.broadcasted_iota(jnp.int32, (n_p, h_p), 1) == hidden_dim
    wh = w * jnp.where(den_col, 1.0, h2)                              # [Np, Hp]
    num = jnp.dot(seg, wh, preferred_element_type=jnp.float32)        # [G8, Hp]
    den = jnp.maximum(num[:, hidden_dim:hidden_dim + 1], 1e-30)       # guard empty graphs
    pooled = num / den                                                # lane-dense [G8, Hp]
    return jnp.dot(pooled, wmu, preferred_element_type=jnp.float32) + bmu


# --------------------------------------------------------------------------------
# kernel A: fully fused encoder (small / medium graphs, everything VMEM-resident)
# --------------------------------------------------------------------------------

def _fused_encoder_kernel(a_ref, f1_ref, b1_ref, w2_ref, b2_ref, gw_ref,
                          seg_ref, segt_ref, wmu_ref, bmu_ref, out_ref, *,
                          hidden_dim):
    a = a_ref[...]                                                    # [Np, Np] bf16
    # conv1 + ReLU  (dropout is identity in eval mode)
    h1 = jnp.dot(a, f1_ref[...], preferred_element_type=jnp.float32) + b1_ref[...]
    h1 = jnp.maximum(h1, 0.0)
    # conv2's weight transform, then the second a_hat product
    t2 = jnp.dot(h1.astype(jnp.bfloat16), w2_ref[...],
                 preferred_element_type=jnp.float32)
    h2 = jnp.dot(a, t2.astype(jnp.bfloat16),
                 preferred_element_type=jnp.float32) + b2_ref[...]
    out_ref[...] = _attention_pool_project(
        h2, seg_ref[...], segt_ref[...], gw_ref[...], wmu_ref[...], bmu_ref[...],
        hidden_dim=hidden_dim)


def fused_graph_encoder(a_p, feat1, b1_p, w2_p, b2_p, gw_row, seg, seg_t,
                        wmu_p, bmu_p, *, hidden_dim):
    n_p = a_p.shape[0]
    h_p = feat1.shape[1]
    g8 = seg.shape[0]
    l_p = wmu_p.shape[1]
    vmem = pl.BlockSpec(memory_space=pltpu.MemorySpace.VMEM)
    flops = 4 * n_p * n_p * h_p + 2 * n_p * h_p * h_p + 2 * g8 * n_p * h_p
    bytes_accessed = int(sum(int(t.size) * t.dtype.itemsize
                             for t in (a_p, feat1, w2_p, seg, seg_t, wmu_p))
                         + g8 * l_p * 4)
    return pl.pallas_call(
        functools.partial(_fused_encoder_kernel, hidden_dim=hidden_dim),
        out_shape=jax.ShapeDtypeStruct((g8, l_p), jnp.float32),
        in_specs=[vmem] * 10,
        out_specs=vmem,
        compiler_params=pltpu.CompilerParams(vmem_limit_bytes=_VMEM_LIMIT),
        cost_estimate=pl.CostEstimate(flops=flops, transcendentals=n_p,
                                      bytes_accessed=bytes_accessed),
    )(a_p, feat1, b1_p, w2_p, b2_p, gw_row, seg, seg_t, wmu_p, bmu_p)


# --------------------------------------------------------------------------------
# kernel B: tiled GCN layer  out = [relu](a_hat @ feat + bias) [@ w_next]
#           (large-N fallback; feature matrix is VMEM-resident, a_hat streamed)
# --------------------------------------------------------------------------------

def _make_gcn_kernel(apply_relu: bool, fuse_next: bool):

    def _epilogue(acc, bias, o_ref, wn=None):
        h = acc + bias
        if apply_relu:
            h = jnp.maximum(h, 0.0)
        if wn is not None:
            h = jnp.dot(h.astype(jnp.bfloat16), wn,
                        preferred_element_type=jnp.float32)
        o_ref[...] = h.astype(o_ref.dtype)

    def _accumulate(a_ref, f_ref, acc_ref):
        k = pl.program_id(1)

        @pl.when(k == 0)
        def _():
            acc_ref[...] = jnp.zeros_like(acc_ref)

        tk = a_ref.shape[1]
        start = pl.multiple_of(k * tk, tk)
        acc_ref[...] += jnp.dot(a_ref[...], f_ref[pl.ds(start, tk), :],
                                preferred_element_type=jnp.float32)

    if fuse_next:
        def kernel(a_ref, f_ref, b_ref, wn_ref, o_ref, acc_ref):
            _accumulate(a_ref, f_ref, acc_ref)

            @pl.when(pl.program_id(1) == pl.num_programs(1) - 1)
            def _():
                _epilogue(acc_ref[...], b_ref[...], o_ref, wn_ref[...])
    else:
        def kernel(a_ref, f_ref, b_ref, o_ref, acc_ref):
            _accumulate(a_ref, f_ref, acc_ref)

            @pl.when(pl.program_id(1) == pl.num_programs(1) - 1)
            def _():
                _epilogue(acc_ref[...], b_ref[...], o_ref)

    return kernel


def gcn_layer(a_bf16, feat_bf16, bias_f32, w_next_bf16=None, *,
              apply_relu, out_dtype, tm=128, tk=256):
    """Tiled  out = [relu](a_hat @ feat + bias) [@ w_next]  with bf16 MXU inputs."""
    n_p = a_bf16.shape[0]
    h_p = feat_bf16.shape[1]
    assert n_p % tm == 0 and n_p % tk == 0, "pad N to a multiple of the tile sizes"
    grid = (n_p // tm, n_p // tk)
    fuse = w_next_bf16 is not None

    in_specs = [
        pl.BlockSpec((tm, tk), lambda i, k: (i, k)),        # a_hat tile (streamed)
        pl.BlockSpec((n_p, h_p), lambda i, k: (0, 0)),      # features: VMEM-resident
        pl.BlockSpec((1, h_p), lambda i, k: (0, 0)),        # bias row
    ]
    inputs = [a_bf16, feat_bf16, bias_f32]
    flops = 2 * n_p * n_p * h_p
    if fuse:
        in_specs.append(pl.BlockSpec((h_p, h_p), lambda i, k: (0, 0)))  # fused W_next
        inputs.append(w_next_bf16)
        flops += 2 * n_p * h_p * h_p

    bytes_accessed = int(a_bf16.size * a_bf16.dtype.itemsize
                         + feat_bf16.size * feat_bf16.dtype.itemsize
                         + n_p * h_p * jnp.dtype(out_dtype).itemsize)

    # TODO(synk): stream (A+I) as int8/fp8 with D^-1/2 applied on the narrow side
    # for a further ~2x HBM-traffic cut on the dominant N^2 stream.
    return pl.pallas_call(
        _make_gcn_kernel(apply_relu, fuse),
        out_shape=jax.ShapeDtypeStruct((n_p, h_p), out_dtype),
        grid_spec=pltpu.PrefetchScalarGridSpec(
            num_scalar_prefetch=0,
            grid=grid,
            in_specs=in_specs,
            out_specs=pl.BlockSpec((tm, h_p), lambda i, k: (i, 0)),
            scratch_shapes=[pltpu.VMEM((tm, h_p), jnp.float32)],
        ),
        compiler_params=pltpu.CompilerParams(
            dimension_semantics=("parallel", "arbitrary"),
            vmem_limit_bytes=_VMEM_LIMIT,
        ),
        cost_estimate=pl.CostEstimate(flops=flops, transcendentals=0,
                                      bytes_accessed=bytes_accessed),
    )(*inputs)


# --------------------------------------------------------------------------------
# kernel C: GlobalAttention pooling + mean_layer (large-N fallback head)
# --------------------------------------------------------------------------------

def _pool_head_kernel(h2_ref, seg_ref, segt_ref, gw_ref, wmu_ref, bmu_ref,
                      out_ref, *, hidden_dim):
    # h2 arrives as bf16 (halves HBM writeback/reload); upcast once for the VPU math.
    out_ref[...] = _attention_pool_project(
        h2_ref[...].astype(jnp.float32), seg_ref[...], segt_ref[...],
        gw_ref[...], wmu_ref[...], bmu_ref[...], hidden_dim=hidden_dim)


def attention_pool_head(h2_bf16, seg_f32, segt_f32, gw_row_f32, wmu_f32, bmu_f32,
                        *, hidden_dim):
    g8 = seg_f32.shape[0]
    l_p = wmu_f32.shape[1]
    vmem = pl.BlockSpec(memory_space=pltpu.MemorySpace.VMEM)
    # TODO(synk): for very large N, tile over node blocks with an online segment
    # softmax instead of holding h2/seg in one VMEM block.
    return pl.pallas_call(
        functools.partial(_pool_head_kernel, hidden_dim=hidden_dim),
        out_shape=jax.ShapeDtypeStruct((g8, l_p), jnp.float32),
        in_specs=[vmem] * 6,
        out_specs=vmem,
        compiler_params=pltpu.CompilerParams(vmem_limit_bytes=_VMEM_LIMIT),
    )(h2_bf16, seg_f32, segt_f32, gw_row_f32, wmu_f32, bmu_f32)


# --------------------------------------------------------------------------------
# forward (wrapper) + plain-JAX glue
# --------------------------------------------------------------------------------

def build_gcn_adjacency(edge_index, num_nodes):
    """Dense D^-1/2 (A + I) D^-1/2 from edge_index [2, E] (src -> dst)."""
    src, dst = edge_index[0], edge_index[1]
    a = jnp.zeros((num_nodes, num_nodes), jnp.float32)
    a = a.at[dst, src].add(1.0)
    a = a + jnp.eye(num_nodes, dtype=jnp.float32)
    deg = jnp.sum(a, axis=1)
    d_inv_sqrt = jnp.where(deg > 0, 1.0 / jnp.sqrt(deg), 0.0)
    return d_inv_sqrt[:, None] * a * d_inv_sqrt[None, :]


def graph_encoder_forward(x, edge_index, batch, params, num_graphs, latent_dim,
                          *, tm=128, tk=256, force_tiled=False):
    (w1, b1, w2, b2, gw, gb, wmu, bmu) = params
    del gb  # gate bias cancels inside the per-graph softmax (shift invariance)
    num_nodes = x.shape[0]
    hidden_dim = w1.shape[1]

    a_hat = build_gcn_adjacency(edge_index, num_nodes)

    # lane/sublane-friendly padded sizes
    h_p = _round_up(hidden_dim + 1, 128)   # +1 spare lane carries the softmax denom
    l_p = _round_up(latent_dim, 128)
    g8 = _round_up(num_graphs, 8)
    gl = _round_up(num_graphs, 128)

    # Fused path only when the resident footprint comfortably fits VMEM everywhere.
    n_fused = _round_up(num_nodes, 128)
    resident = (2 * n_fused * n_fused              # a_hat bf16
                + 14 * n_fused * h_p               # feat bf16 + h1/t2/h2 f32
                + 4 * n_fused * (gl + g8)          # seg_t / seg f32
                + 8 * h_p * max(h_p, l_p))         # small weights slack
    use_fused = (not force_tiled) and resident <= _FUSED_RESIDENT_BUDGET

    n_p = n_fused if use_fused else _round_up(num_nodes, math.lcm(tm, tk))

    # Cast to the narrow dtype BEFORE padding (no padded f32 N^2 intermediate).
    a_p = _pad2(a_hat.astype(jnp.bfloat16), n_p, n_p)
    # x @ W1 hoisted out of the kernels (contraction depth F_in is tiny).
    feat1 = _pad2(jnp.dot(x, w1).astype(jnp.bfloat16), n_p, h_p)
    b1_p = _pad2(b1, 1, h_p)
    w2_p = _pad2(w2.astype(jnp.bfloat16), h_p, h_p)
    b2_p = _pad2(b2, 1, h_p)
    gw_row = _pad2(gw.T, 1, h_p)
    onehot = jax.nn.one_hot(batch, num_graphs, dtype=jnp.float32)     # [N, G]
    seg_t = _pad2(onehot, n_p, gl)                                    # node-major
    seg = _pad2(onehot.T, g8, n_p)                                    # graph-major
    wmu_p = _pad2(wmu, h_p, l_p)
    bmu_p = _pad2(bmu, 1, l_p)

    # TODO(synk): F.dropout(training=True) omitted -- identity (eval-mode) semantics.
    if use_fused:
        mu_p = fused_graph_encoder(a_p, feat1, b1_p, w2_p, b2_p, gw_row,
                                   seg, seg_t, wmu_p, bmu_p,
                                   hidden_dim=hidden_dim)
    else:
        # conv1 + ReLU, with conv2's weight transform fused into the epilogue:
        #   t2 = relu(a_hat @ (x @ W1) + b1) @ W2
        t2 = gcn_layer(a_p, feat1, b1_p, w2_p, apply_relu=True,
                       out_dtype=jnp.bfloat16, tm=tm, tk=tk)
        # conv2:  h2 = a_hat @ t2 + b2   (bf16 writeback halves HBM traffic)
        h2 = gcn_layer(a_p, t2, b2_p, None, apply_relu=False,
                       out_dtype=jnp.bfloat16, tm=tm, tk=tk)
        mu_p = attention_pool_head(h2, seg, seg_t, gw_row, wmu_p, bmu_p,
                                   hidden_dim=hidden_dim)

    # TODO(synk): var_layer / reparameterized z are not materialized -- the module's
    # forward returns mu only.
    return mu_p[:num_graphs, :latent_dim]


def reference_forward(a_hat, x, params, seg):
    """Pure-JAX f32 reference of the module's math, for a correctness check."""
    (w1, b1, w2, b2, gw, gb, wmu, bmu) = params
    h1 = jnp.maximum(a_hat @ (x @ w1) + b1, 0.0)
    h2 = a_hat @ (h1 @ w2) + b2
    gate = (h2 @ gw + gb).T                                           # [1, N]
    logits = jnp.where(seg > 0.0, jnp.broadcast_to(gate, seg.shape), -1e30)
    m = jnp.max(logits, axis=-1, keepdims=True)
    p = jnp.exp(logits - m) * seg
    alpha = p / jnp.sum(p, axis=-1, keepdims=True)
    pooled = alpha @ h2
    return pooled @ wmu + bmu


# --------------------------------------------------------------------------------
# demo / self-test
# --------------------------------------------------------------------------------

if __name__ == "__main__":
    NODES_PER_GRAPH = 100
    G = 2
    N = NODES_PER_GRAPH * G          # 200 nodes -> padded to 256 inside the wrapper
    F_IN = 8                         # num_inputs
    H = 32                           # hidden_dim
    L = 16                           # latent_dim

    key = jax.random.PRNGKey(0)
    k_x, k_w1, k_b1, k_w2, k_b2, k_gw, k_gb, k_wmu, k_bmu = jax.random.split(key, 9)

    x = jax.random.normal(k_x, (N, F_IN), jnp.float32)

    # deterministic edges: a bidirectional ring inside each graph
    src_list, dst_list = [], []
    for g in range(G):
        base = g * NODES_PER_GRAPH
        for i in range(NODES_PER_GRAPH):
            a_node = base + i
            b_node = base + (i + 1) % NODES_PER_GRAPH
            src_list += [a_node, b_node]
            dst_list += [b_node, a_node]
    edge_index = jnp.array([src_list, dst_list], dtype=jnp.int32)
    batch = jnp.repeat(jnp.arange(G, dtype=jnp.int32), NODES_PER_GRAPH)

    # deterministic parameter init (shapes follow the module's __init__)
    scale = 0.1
    params = (
        scale * jax.random.normal(k_w1, (F_IN, H), jnp.float32),   # conv1 weight
        scale * jax.random.normal(k_b1, (1, H), jnp.float32),      # conv1 bias
        scale * jax.random.normal(k_w2, (H, H), jnp.float32),      # conv2 weight
        scale * jax.random.normal(k_b2, (1, H), jnp.float32),      # conv2 bias
        scale * jax.random.normal(k_gw, (H, 1), jnp.float32),      # attention gate weight
        scale * jax.random.normal(k_gb, (1, 1), jnp.float32),      # attention gate bias
        scale * jax.random.normal(k_wmu, (H, L), jnp.float32),     # mean_layer weight
        scale * jax.random.normal(k_bmu, (1, L), jnp.float32),     # mean_layer bias
    )

    # fused (default) path
    mu_fused = graph_encoder_forward(x, edge_index, batch, params, G, L)
    mu_fused = jax.block_until_ready(mu_fused)

    # tiled large-N fallback path (forced, to validate it at demo scale too)
    mu_tiled = graph_encoder_forward(x, edge_index, batch, params, G, L,
                                     force_tiled=True)
    mu_tiled = jax.block_until_ready(mu_tiled)

    a_hat = build_gcn_adjacency(edge_index, N)
    seg = jax.nn.one_hot(batch, G, dtype=jnp.float32).T
    mu_ref = reference_forward(a_hat, x, params, seg)

    assert mu_fused.shape == (G, L) and mu_tiled.shape == (G, L)
    for name, mu in (("fused", mu_fused), ("tiled", mu_tiled)):
        max_diff = float(jnp.max(jnp.abs(mu - mu_ref)))
        assert jnp.allclose(mu, mu_ref, atol=2e-2, rtol=2e-2), (
            f"{name} kernel mismatch vs reference (bf16 tolerance): "
            f"max abs diff {max_diff}")
    print("KERNEL_OK")
</pallas_src>

<mosaic_0001>
module attributes {stable_mosaic.version = 11 : i64} {
  func.func @_fused_encoder_kernel(%arg0: memref<256x256xbf16, #tpu.memory_space<vmem>>, %arg1: memref<256x128xbf16, #tpu.memory_space<vmem>>, %arg2: memref<1x128xf32, #tpu.memory_space<vmem>>, %arg3: memref<128x128xbf16, #tpu.memory_space<vmem>>, %arg4: memref<1x128xf32, #tpu.memory_space<vmem>>, %arg5: memref<1x128xf32, #tpu.memory_space<vmem>>, %arg6: memref<8x256xf32, #tpu.memory_space<vmem>>, %arg7: memref<256x128xf32, #tpu.memory_space<vmem>>, %arg8: memref<128x128xf32, #tpu.memory_space<vmem>>, %arg9: memref<1x128xf32, #tpu.memory_space<vmem>>, %arg10: memref<8x128xf32, #tpu.memory_space<vmem>>) attributes {dimension_semantics = [], scalar_prefetch = 0 : i64, scratch_operands = 0 : i64, tpu.core_type = #tpu.core_type<tc>} {
    %c0 = arith.constant 0 : index
    %c0_0 = arith.constant 0 : index
    %0 = vector.load %arg0[%c0, %c0_0] : memref<256x256xbf16, #tpu.memory_space<vmem>>, vector<256x256xbf16>
    %c0_1 = arith.constant 0 : index
    %c0_2 = arith.constant 0 : index
    %1 = vector.load %arg1[%c0_1, %c0_2] : memref<256x128xbf16, #tpu.memory_space<vmem>>, vector<256x128xbf16>
    %cst = arith.constant dense<0.000000e+00> : vector<256x128xf32>
    %2 = tpu.matmul %0, %1, %cst {dimension_numbers = #tpu.dot_dimension_numbers<[1], [0], [0], [1], [0, 0, 1, 1], [], []>} : vector<256x256xbf16>, vector<256x128xbf16>, vector<256x128xf32> -> vector<256x128xf32>
    %c0_3 = arith.constant 0 : index
    %c0_4 = arith.constant 0 : index
    %3 = vector.load %arg2[%c0_3, %c0_4] : memref<1x128xf32, #tpu.memory_space<vmem>>, vector<1x128xf32>
    %4 = vector.broadcast %3 : vector<1x128xf32> to vector<256x128xf32>
    %5 = arith.addf %2, %4 : vector<256x128xf32>
    %cst_5 = arith.constant 0.000000e+00 : f32
    %6 = vector.broadcast %cst_5 : f32 to vector<256x128xf32>
    %7 = arith.maximumf %5, %6 : vector<256x128xf32>
    %8 = arith.truncf %7 : vector<256x128xf32> to vector<256x128xbf16>
    %c0_6 = arith.constant 0 : index
    %c0_7 = arith.constant 0 : index
    %9 = vector.load %arg3[%c0_6, %c0_7] : memref<128x128xbf16, #tpu.memory_space<vmem>>, vector<128x128xbf16>
    %cst_8 = arith.constant dense<0.000000e+00> : vector<256x128xf32>
    %10 = tpu.matmul %8, %9, %cst_8 {dimension_numbers = #tpu.dot_dimension_numbers<[1], [0], [0], [1], [0, 0, 1, 1], [], []>} : vector<256x128xbf16>, vector<128x128xbf16>, vector<256x128xf32> -> vector<256x128xf32>
    %11 = arith.truncf %10 : vector<256x128xf32> to vector<256x128xbf16>
    %cst_9 = arith.constant dense<0.000000e+00> : vector<256x128xf32>
    %12 = tpu.matmul %0, %11, %cst_9 {dimension_numbers = #tpu.dot_dimension_numbers<[1], [0], [0], [1], [0, 0, 1, 1], [], []>} : vector<256x256xbf16>, vector<256x128xbf16>, vector<256x128xf32> -> vector<256x128xf32>
    %c0_10 = arith.constant 0 : index
    %c0_11 = arith.constant 0 : index
    %13 = vector.load %arg4[%c0_10, %c0_11] : memref<1x128xf32, #tpu.memory_space<vmem>>, vector<1x128xf32>
    %14 = vector.broadcast %13 : vector<1x128xf32> to vector<256x128xf32>
    %15 = arith.addf %12, %14 : vector<256x128xf32>
    %c0_12 = arith.constant 0 : index
    %c0_13 = arith.constant 0 : index
    %16 = vector.load %arg6[%c0_12, %c0_13] : memref<8x256xf32, #tpu.memory_space<vmem>>, vector<8x256xf32>
    %c0_14 = arith.constant 0 : index
    %c0_15 = arith.constant 0 : index
    %17 = vector.load %arg7[%c0_14, %c0_15] : memref<256x128xf32, #tpu.memory_space<vmem>>, vector<256x128xf32>
    %c0_16 = arith.constant 0 : index
    %c0_17 = arith.constant 0 : index
    %18 = vector.load %arg5[%c0_16, %c0_17] : memref<1x128xf32, #tpu.memory_space<vmem>>, vector<1x128xf32>
    %c0_18 = arith.constant 0 : index
    %c0_19 = arith.constant 0 : index
    %19 = vector.load %arg8[%c0_18, %c0_19] : memref<128x128xf32, #tpu.memory_space<vmem>>, vector<128x128xf32>
    %c0_20 = arith.constant 0 : index
    %c0_21 = arith.constant 0 : index
    %20 = vector.load %arg9[%c0_20, %c0_21] : memref<1x128xf32, #tpu.memory_space<vmem>>, vector<1x128xf32>
    %21 = vector.broadcast %18 : vector<1x128xf32> to vector<256x128xf32>
    %22 = arith.mulf %15, %21 : vector<256x128xf32>
    %cst_22 = arith.constant dense<0.000000e+00> : vector<256xf32>
    %23 = vector.multi_reduction <add>, %22, %cst_22 [1] : vector<256x128xf32> to vector<256xf32>
    %24 = vector.shape_cast %23 : vector<256xf32> to vector<256x1xf32>
    %25 = vector.shape_cast %24 : vector<256x1xf32> to vector<256x1xf32>
    %26 = vector.broadcast %25 : vector<256x1xf32> to vector<256x128xf32>
    %cst_23 = arith.constant 0.000000e+00 : f32
    %27 = vector.broadcast %cst_23 : f32 to vector<256x128xf32>
    %28 = arith.cmpf ogt, %17, %27 : vector<256x128xf32>
    %cst_24 = arith.constant -1.000000e+30 : f32
    %29 = vector.broadcast %cst_24 : f32 to vector<256x128xf32>
    %30 = arith.select %28, %26, %29 : vector<256x128xi1>, vector<256x128xf32>
    %cst_25 = arith.constant dense<0xFF800000> : vector<128xf32>
    %31 = vector.multi_reduction <maximumf>, %30, %cst_25 [0] : vector<256x128xf32> to vector<128xf32>
    %32 = vector.shape_cast %31 : vector<128xf32> to vector<1x128xf32>
    %33 = vector.broadcast %32 : vector<1x128xf32> to vector<256x128xf32>
    %34 = arith.mulf %17, %33 : vector<256x128xf32>
    %cst_26 = arith.constant dense<0.000000e+00> : vector<256xf32>
    %35 = vector.multi_reduction <add>, %34, %cst_26 [1] : vector<256x128xf32> to vector<256xf32>
    %36 = vector.shape_cast %35 : vector<256xf32> to vector<256x1xf32>
    %37 = arith.subf %24, %36 : vector<256x1xf32>
    %38 = math.exp %37 : vector<256x1xf32>
    %39 = tpu.iota {dimensions = array<i32: 1>} : vector<256x128xi32>
    %c32_i32 = arith.constant 32 : i32
    %40 = vector.broadcast %c32_i32 : i32 to vector<256x128xi32>
    %41 = arith.cmpi eq, %39, %40 : vector<256x128xi32>
    %cst_27 = arith.constant 1.000000e+00 : f32
    %42 = vector.broadcast %cst_27 : f32 to vector<256x128xf32>
    %43 = arith.select %41, %42, %15 : vector<256x128xi1>, vector<256x128xf32>
    %44 = vector.broadcast %38 : vector<256x1xf32> to vector<256x128xf32>
    %45 = arith.mulf %44, %43 : vector<256x128xf32>
    %cst_28 = arith.constant dense<0.000000e+00> : vector<8x128xf32>
    %46 = tpu.matmul %16, %45, %cst_28 {dimension_numbers = #tpu.dot_dimension_numbers<[1], [0], [0], [1], [0, 0, 1, 1], [], []>} : vector<8x256xf32>, vector<256x128xf32>, vector<8x128xf32> -> vector<8x128xf32>
    %47 = vector.extract_strided_slice %46 {offsets = [0, 32], sizes = [8, 1], strides = [1, 1]} : vector<8x128xf32> to vector<8x1xf32>
    %cst_29 = arith.constant 1.000000e-30 : f32
    %48 = vector.broadcast %cst_29 : f32 to vector<8x1xf32>
    %49 = arith.maximumf %47, %48 : vector<8x1xf32>
    %50 = vector.broadcast %49 : vector<8x1xf32> to vector<8x128xf32>
    %51 = arith.divf %46, %50 : vector<8x128xf32>
    %cst_30 = arith.constant dense<0.000000e+00> : vector<8x128xf32>
    %52 = tpu.matmul %51, %19, %cst_30 {dimension_numbers = #tpu.dot_dimension_numbers<[1], [0], [0], [1], [0, 0, 1, 1], [], []>} : vector<8x128xf32>, vector<128x128xf32>, vector<8x128xf32> -> vector<8x128xf32>
    %53 = vector.broadcast %20 : vector<1x128xf32> to vector<8x128xf32>
    %54 = arith.addf %52, %53 : vector<8x128xf32>
    %c0_31 = arith.constant 0 : index
    %c0_32 = arith.constant 0 : index
    %55 = vector.load %arg10[%c0_31, %c0_32] : memref<8x128xf32, #tpu.memory_space<vmem>>, vector<8x128xf32>
    tpu.vector_store %arg10[%c0_31, %c0_32], %54 {strides = array<i32>} : memref<8x128xf32, #tpu.memory_space<vmem>>, vector<8x128xf32>,
    return
  }
}

</mosaic_0001>

<bundles_post_ra>
// kernel: tpu_custom_call.1
= control target key start
LH: loop header
LB: loop body
LE: loop exit
PB: predicated region body
PF: predicated region fallthrough
CT: control target
= control target key end

     0   :  { %15 = vsyncpa [#allocation3], 0  ;;  %s3058_s0 = inlined_call_operand.hbm [shape: bf16[256,256], index: 0, kind: input, shape index: {}]   ;;  %s3059_s1 = inlined_call_operand.hbm [shape: bf16[256,128], index: 1, kind: input, shape index: {}]   ;;  %s3060_s2 = inlined_call_operand.vmem [shape: f32[1,128], index: 2, kind: input, shape index: {}]   ;;  %s3061_s3 = inlined_call_operand.hbm [shape: bf16[128,128], index: 3, kind: input, shape index: {}]   ;;  %s3062_s4 = inlined_call_operand.vmem [shape: f32[1,128], index: 4, kind: input, shape index: {}]   ;;  %s3063_s5 = inlined_call_operand.vmem [shape: f32[1,128], index: 5, kind: input, shape index: {}]   ;;  %s3064_s6 = inlined_call_operand.hbm [shape: f32[8,256], index: 6, kind: input, shape index: {}]   ;;  %s3065_s7 = inlined_call_operand.hbm [shape: f32[256,128], index: 7, kind: input, shape index: {}]   ;;  %s3066_s8 = inlined_call_operand.hbm [shape: f32[128,128], index: 8, kind: input, shape index: {}]   ;;  %s3067_s9 = inlined_call_operand.vmem [shape: f32[1,128], index: 9, kind: input, shape index: {}]   ;;  %s3068_s10 = inlined_call_operand.hbm [shape: f32[8,128], index: 10, kind: output, shape index: {}]  }
   0x1   :  { %16 = vsyncpa [#allocation6], 0 }
   0x2   :  { %17 = vsyncpa [#allocation9], 0 }
   0x3   :  { %18 = vsyncpa [#allocation12], 0  ;;  %s37_s15 = sshll.u32 %s3059_s1, 4  ;;  %s38_s15 = int_to_ptr.hbm [resolvable:$true] %s37_s15 }
   0x4   :  { %19 = vsyncpa [#allocation4], 0  ;;  %s2211_s16 = smov [#allocation5]   ;;  %s70_s20 = sshll.u32 %s3064_s6, 4  ;;  %s71_s20 = int_to_ptr.hbm [resolvable:$true] %s70_s20 }
   0x5   :  { %s39_s17 = sshll.u32 %s2211_s16, 4  ;;  %s2212_s21 = smov 64   ;;  %s40_s17 = int_to_ptr.vmem [resolvable:$true] %s39_s17 }
   0x6   :  { %s2213_s22 = smov 4   ;;  %s2214_s23 = smov [#allocation8]  }
   0x7   :  { %45 = dma.hbm_to_vmem [thread:$0]  %s38_s15, 2048, %s40_s17, [#allocation6], %s2212_s21, %s2212_s21, %s2213_s22  }
   0x8   :  { %s72_s24 = sshll.u32 %s2214_s23, 4  ;;  %s24_s27 = sshll.u32 %s3058_s0, 4  ;;  %s73_s24 = int_to_ptr.vmem [resolvable:$true] %s72_s24  ;;  %s25_s27 = int_to_ptr.hbm [resolvable:$true] %s24_s27 }
   0x9   :  { %75 = dma.hbm_to_vmem [thread:$0]  %s71_s20, 256, %s73_s24, [#allocation9]  }
   0xa   :  { %s2215_s1 = smov [#allocation2]   ;;  %s52_s6 = sshll.u32 %s3061_s3, 4  ;;  %s53_s6 = int_to_ptr.hbm [resolvable:$true] %s52_s6 }
   0xb   :  { %s26_s28 = sshll.u32 %s2215_s1, 4  ;;  %s2216_s11 = smov 128   ;;  %s27_s28 = int_to_ptr.vmem [resolvable:$true] %s26_s28 }
   0xc   :  { %s2217_s12 = smov 8   ;;  %s2218_s13 = smov [#allocation7]  }
   0xd   :  { %32 = dma.hbm_to_vmem [thread:$0]  %s25_s27, 4096, %s27_s28, [#allocation3], %s2216_s11, %s2216_s11, %s2217_s12  }
   0xe   :  { %s54_s14 = sshll.u32 %s2218_s13, 4  ;;  %s80_s0 = sshll.u32 %s3065_s7, 4  ;;  %s55_s14 = int_to_ptr.vmem [resolvable:$true] %s54_s14  ;;  %s81_s0 = int_to_ptr.hbm [resolvable:$true] %s80_s0 }
   0xf   :  { %60 = dma.hbm_to_vmem [thread:$0]  %s53_s6, 1024, %s55_s14, [#allocation6], %s2212_s21, %s2212_s21, %s2213_s22  }
  0x10   :  { %s93_s19 = sshll.u32 %s3066_s8, 4  ;;  %s2219_s20 = smov [#allocation10]   ;;  %s94_s19 = int_to_ptr.hbm [resolvable:$true] %s93_s19 }
  0x11   :  { %s82_s23 = sshll.u32 %s2219_s20, 4  ;;  %s2220_s3 = smov [#allocation11]   ;;  %s83_s23 = int_to_ptr.vmem [resolvable:$true] %s82_s23 }
  0x12   :  { %88 = dma.hbm_to_vmem [thread:$0]  %s81_s0, 4096, %s83_s23, [#allocation9], %s2216_s11, %s2216_s11, %s2217_s12  }
  0x13   :  { %s95_s24 = sshll.u32 %s2220_s3, 4  ;;  %s96_s24 = int_to_ptr.vmem [resolvable:$true] %s95_s24 }
  0x14   :  { %101 = dma.hbm_to_vmem [thread:$0]  %s94_s19, 2048, %s96_s24, [#allocation12], %s2216_s11, %s2216_s11, %s2217_s12  }
  0x15   :  { %2201 = dma.done.wait [#allocation3], 4096  }
  0x16   :  { %2202 = vsyncadd [#allocation3], 4294963200 }
  0x17   :  { %2203 = dma.done.wait [#allocation6], 3072  }
  0x18   :  { %2204 = vsyncadd [#allocation6], 4294964224 }
  0x19   :  { %2205 = dma.done.wait [#allocation9], 4352  }
  0x1a   :  { %2206 = vsyncadd [#allocation9], 4294962944 }
  0x1b   :  { %2207 = dma.done.wait [#allocation12], 2048  }
  0x1c   :  { %2208 = vsyncadd [#allocation12], 4294965248  ;;  %v1908_v0 = vld [vmem:[#allocation5 + $0x38] sm:$0xff]  ;;  %v1907_v1 = vld [vmem:[#allocation5 + $0x30] sm:$0xff]  ;;  %s2222_s26 = smov [#allocation13]   ;;  %s1632_s29 = sshll.u32 %s3068_s10, 4  ;;  %s1633_s29 = int_to_ptr.hbm [resolvable:$true] %s1632_s29 }
  0x1d   :  { %1925 = vmatpush.bf16.msra.mxu1 %v1908_v0  ;;  %452 = vmatpush.bf16.msra.mxu0 %v1908_v0  ;;  %v1906_v2 = vld [vmem:[#allocation5 + $0x28] sm:$0xff]  ;;  %v1905_v3 = vld [vmem:[#allocation5 + $0x20] sm:$0xff]  ;;  %v1904_v4 = vld [vmem:[#allocation5 + $0x18] sm:$0xff]  ;;  %s1630_s27 = sshll.u32 %s2222_s26, 4  ;;  %s1631_s27 = int_to_ptr.vmem [resolvable:$true] %s1630_s27 }
  0x1e   :  { %1926 = vmatpush.bf16.msra.mxu2 %v1908_v0  ;;  %1927 = vmatpush.bf16.msra.mxu3 %v1908_v0  ;;  %v1903_v5 = vld [vmem:[#allocation5 + $0x10] sm:$0xff]  ;;  %v1902_v6 = vld [vmem:[#allocation5 + $0x8] sm:$0xff]  ;;  %v1901_v7 = vld [vmem:[#allocation5] sm:$0xff] }
  0x1f   :  { %v1687_v8 = vld [vmem:[#allocation2 + $0x50] sm:$0xf]  ;;  %v1880_v9 = vld [vmem:[#allocation2 + $0x54] sm:$0xf0]  ;;  %v1914_v13 = vld [vmem:[#allocation5 + $0x68] sm:$0xff] }
  0x20   :  { %v2296_v10 = vor.u32 %v1880_v9, %v1687_v8  ;;  %v1916_v11 = vld [vmem:[#allocation5 + $0x78] sm:$0xff]  ;;  %v1915_v12 = vld [vmem:[#allocation5 + $0x70] sm:$0xff]  ;;  %v1695_v14 = vld [vmem:[#allocation2 + $0x60] sm:$0xf] }
  0x21   :  { %1928 = vmatpush.bf16.msra.mxu1 %v1907_v1  ;;  %453 = vmatpush.bf16.msra.mxu0 %v1907_v1  ;;  %v1882_v15 = vld [vmem:[#allocation2 + $0x64] sm:$0xf0]  ;;  %v1913_v16 = vld [vmem:[#allocation5 + $0x60] sm:$0xff]  ;;  %v1912_v18 = vld [vmem:[#allocation5 + $0x58] sm:$0xff] }
  0x22   :  { %1929 = vmatpush.bf16.msra.mxu2 %v1907_v1  ;;  %1930 = vmatpush.bf16.msra.mxu3 %v1907_v1  ;;  %v2299_v17 = vor.u32 %v1882_v15, %v1695_v14  ;;  %v1647_v19 = vld [vmem:[#allocation2] sm:$0xf]  ;;  %v1870_v20 = vld [vmem:[#allocation2 + $0x4] sm:$0xf0]  ;;  %v1911_v21 = vld [vmem:[#allocation5 + $0x50] sm:$0xff] }
  0x23   :  { %v2302_v22 = vor.u32 %v1870_v20, %v1647_v19  ;;  %v1910_v23 = vld [vmem:[#allocation5 + $0x48] sm:$0xff]  ;;  %v1703_v24 = vld [vmem:[#allocation2 + $0x70] sm:$0xf]  ;;  %v1884_v25 = vld [vmem:[#allocation2 + $0x74] sm:$0xf0] }
  0x24   :  { %v1909_v26 = vld [vmem:[#allocation5 + $0x40] sm:$0xff]  ;;  %v2305_v27 = vor.u32 %v1884_v25, %v1703_v24  ;;  %v1655_v28 = vld [vmem:[#allocation2 + $0x10] sm:$0xf]  ;;  %v1872_v29 = vld [vmem:[#allocation2 + $0x14] sm:$0xf0] }
  0x25   :  { %1931 = vmatpush.bf16.msra.mxu1 %v1906_v2  ;;  %454 = vmatpush.bf16.msra.mxu0 %v1906_v2  ;;  %v2308_v30 = vor.u32 %v1872_v29, %v1655_v28  ;;  %v1711_v31 = vld [vmem:[#allocation2 + $0x80] sm:$0xf]  ;;  %v1886_v32 = vld [vmem:[#allocation2 + $0x84] sm:$0xf0]  ;;  %v1869_v37 = vld [vmem:[#allocation2 + $0x4] sm:$0xf] }
  0x26   :  { %1932 = vmatpush.bf16.msra.mxu2 %v1906_v2  ;;  %1933 = vmatpush.bf16.msra.mxu3 %v1906_v2  ;;  %v2311_v33 = vor.u32 %v1886_v32, %v1711_v31  ;;  %v1663_v34 = vld [vmem:[#allocation2 + $0x20] sm:$0xf]  ;;  %v1874_v35 = vld [vmem:[#allocation2 + $0x24] sm:$0xf0]  ;;  %v1649_v38 = vld [vmem:[#allocation2 + $0x8] sm:$0xf0] }
  0x27   :  { %v2314_v36 = vor.u32 %v1874_v35, %v1663_v34  ;;  %v2317_v39 = vor.u32 %v1869_v37, %v1649_v38  ;;  %v1671_v40 = vld [vmem:[#allocation2 + $0x30] sm:$0xf]  ;;  %v1876_v41 = vld [vmem:[#allocation2 + $0x34] sm:$0xf0]  ;;  %v1871_v43 = vld [vmem:[#allocation2 + $0x14] sm:$0xf] }
  0x28   :  { %v2320_v42 = vor.u32 %v1876_v41, %v1671_v40  ;;  %v1657_v44 = vld [vmem:[#allocation2 + $0x18] sm:$0xf0]  ;;  %v1679_v46 = vld [vmem:[#allocation2 + $0x40] sm:$0xf]  ;;  %v1878_v47 = vld [vmem:[#allocation2 + $0x44] sm:$0xf0] }
  0x29   :  { %1934 = vmatpush.bf16.msra.mxu1 %v1905_v3  ;;  %455 = vmatpush.bf16.msra.mxu0 %v1905_v3  ;;  %v2323_v45 = vor.u32 %v1871_v43, %v1657_v44  ;;  %v2326_v48 = vor.u32 %v1878_v47, %v1679_v46  ;;  %v1873_v49 = vld [vmem:[#allocation2 + $0x24] sm:$0xf]  ;;  %v1665_v50 = vld [vmem:[#allocation2 + $0x28] sm:$0xf0]  ;;  %v1719_v52 = vld [vmem:[#allocation2 + $0x90] sm:$0xf] }
  0x2a   :  { %1935 = vmatpush.bf16.msra.mxu2 %v1905_v3  ;;  %1936 = vmatpush.bf16.msra.mxu3 %v1905_v3  ;;  %v2329_v51 = vor.u32 %v1873_v49, %v1665_v50  ;;  %v1888_v53 = vld [vmem:[#allocation2 + $0x94] sm:$0xf0]  ;;  %v1875_v55 = vld [vmem:[#allocation2 + $0x34] sm:$0xf]  ;;  %v1673_v56 = vld [vmem:[#allocation2 + $0x38] sm:$0xf0] }
  0x2b   :  { %v2332_v54 = vor.u32 %v1888_v53, %v1719_v52  ;;  %v2335_v57 = vor.u32 %v1875_v55, %v1673_v56  ;;  %v1727_v58 = vld [vmem:[#allocation2 + $0xa0] sm:$0xf]  ;;  %v1890_v59 = vld [vmem:[#allocation2 + $0xa4] sm:$0xf0]  ;;  %v1877_v61 = vld [vmem:[#allocation2 + $0x44] sm:$0xf] }
  0x2c   :  { %v2338_v60 = vor.u32 %v1890_v59, %v1727_v58  ;;  %v1681_v62 = vld [vmem:[#allocation2 + $0x48] sm:$0xf0]  ;;  %v1735_v1 = vld [vmem:[#allocation2 + $0xb0] sm:$0xf]  ;;  %v1892_v2 = vld [vmem:[#allocation2 + $0xb4] sm:$0xf0] }
  0x2d   :  { %1937 = vmatpush.bf16.msra.mxu1 %v1904_v4  ;;  %456 = vmatpush.bf16.msra.mxu0 %v1904_v4  ;;  %v2341_v63 = vor.u32 %v1877_v61, %v1681_v62  ;;  %v2346_v3 = vor.u32 %v1892_v2, %v1735_v1  ;;  %v1922_v15 = vld [vmem:[#allocation7 + $0x28] sm:$0xff]  ;;  %v1881_v19 = vld [vmem:[#allocation2 + $0x64] sm:$0xf]  ;;  %v1919_v25 = vld [vmem:[#allocation7 + $0x10] sm:$0xff] }
  0x2e   :  { %1938 = vmatpush.bf16.msra.mxu2 %v1904_v4  ;;  %1939 = vmatpush.bf16.msra.mxu3 %v1904_v4  ;;  %v1697_v20 = vld [vmem:[#allocation2 + $0x68] sm:$0xf0]  ;;  %v1917_v31 = vld [vmem:[#allocation7] sm:$0xff]  ;;  %v1883_v32 = vld [vmem:[#allocation2 + $0x74] sm:$0xf] }
  0x2f   :  { %v1705_v34 = vld [vmem:[#allocation2 + $0x78] sm:$0xf0]  ;;  %v1885_v41 = vld [vmem:[#allocation2 + $0x84] sm:$0xf]  ;;  %v1713_v43 = vld [vmem:[#allocation2 + $0x88] sm:$0xf0] }
  0x30   :  { %v2368_v35 = vor.u32 %v1883_v32, %v1705_v34  ;;  %v2375_v46 = vor.u32 %v1885_v41, %v1713_v43  ;;  %v2380_v49 = vld [vmem:[%s3060_s2] ss:$0 sm:$0xff]  ;;  %v1887_v62 = vld [vmem:[#allocation2 + $0x94] sm:$0xf]  ;;  %v1721_v1 = vld [vmem:[#allocation2 + $0x98] sm:$0xf0] }
  0x31   :  { %1940 = vmatpush.bf16.msra.mxu1 %v1903_v5  ;;  %457 = vmatpush.bf16.msra.mxu0 %v1903_v5  ;;  %v1751_v34 = vld [vmem:[#allocation2 + $0xd0] sm:$0xf] }
  0x32   :  { %1941 = vmatpush.bf16.msra.mxu2 %v1903_v5  ;;  %1942 = vmatpush.bf16.msra.mxu3 %v1903_v5  ;;  %v1879_v5 = vld [vmem:[#allocation2 + $0x54] sm:$0xf] }
  0x35   :  { %1943 = vmatpush.bf16.msra.mxu1 %v1902_v6  ;;  %458 = vmatpush.bf16.msra.mxu0 %v1902_v6 }
  0x36   :  { %1944 = vmatpush.bf16.msra.mxu2 %v1902_v6  ;;  %1945 = vmatpush.bf16.msra.mxu3 %v1902_v6  ;;  %v1689_v6 = vld [vmem:[#allocation2 + $0x58] sm:$0xf0] }
  0x37   :  { %v2351_v8 = vor.u32 %v1879_v5, %v1689_v6  ;;  %v2385_v5 = vor.u32 %v1887_v62, %v1721_v1 }
  0x39   :  { %1946 = vmatpush.bf16.msra.mxu1 %v1901_v7  ;;  %459 = vmatpush.bf16.msra.mxu0 %v1901_v7 }
  0x3a   :  { %1947 = vmatpush.bf16.msra.mxu2 %v1901_v7  ;;  %1948 = vmatpush.bf16.msra.mxu3 %v1901_v7  ;;  %v1924_v7 = vld [vmem:[#allocation7 + $0x38] sm:$0xff] }
  0x3c   :  { %485 = vmatmul.bf16.vlgmr.msra.gmra.mxu1 %v2296_v10  ;;  %460 = vmatmul.bf16.vlgmr.msra.gmra.mxu0 %v2302_v22 }
  0x3d   :  { %541 = vmatpush.bf16.msrb.mxu1 %v1916_v11  ;;  %505 = vmatmul.bf16.vlgmr.msra.gmra.mxu2 %v2332_v54  ;;  %v1923_v11 = vld [vmem:[#allocation7 + $0x30] sm:$0xff] }
  0x3e   :  { %742 = vmatpush.bf16.msrb.mxu2 %v1924_v7 }
  0x41   :  { %542 = vmatpush.bf16.msrb.mxu1 %v1915_v12  ;;  %v1743_v12 = vld [vmem:[#allocation2 + $0xc0] sm:$0xf] }
  0x42   :  { %743 = vmatpush.bf16.msrb.mxu2 %v1923_v11 }
  0x45   :  { %543 = vmatpush.bf16.msrb.mxu1 %v1914_v13  ;;  %v1894_v13 = vld [vmem:[#allocation2 + $0xc4] sm:$0xf0] }
  0x46   :  { %v2356_v14 = vor.u32 %v1894_v13, %v1743_v12  ;;  %744 = vmatpush.bf16.msrb.mxu2 %v1922_v15 }
  0x49   :  { %544 = vmatpush.bf16.msrb.mxu1 %v1913_v16 }
  0x4c   :  { %490 = vmatmul.bf16.gmra.mxu1 %v2299_v17  ;;  %465 = vmatmul.bf16.gmra.mxu0 %v2308_v30 }
  0x4d   :  { %545 = vmatpush.bf16.msrb.mxu1 %v1912_v18  ;;  %510 = vmatmul.bf16.gmra.mxu2 %v2338_v60  ;;  %v1921_v18 = vld [vmem:[#allocation7 + $0x20] sm:$0xff] }
  0x4e   :  { %745 = vmatpush.bf16.msrb.mxu2 %v1921_v18 }
  0x51   :  { %546 = vmatpush.bf16.msrb.mxu1 %v1911_v21  ;;  %v1920_v21 = vld [vmem:[#allocation7 + $0x18] sm:$0xff] }
  0x52   :  { %746 = vmatpush.bf16.msrb.mxu2 %v1920_v21 }
  0x55   :  { %547 = vmatpush.bf16.msrb.mxu1 %v1910_v23  ;;  %v2361_v23 = vor.u32 %v1881_v19, %v1697_v20 }
  0x56   :  { %747 = vmatpush.bf16.msrb.mxu2 %v1919_v25  ;;  %v1889_v25 = vld [vmem:[#allocation2 + $0xa4] sm:$0xf] }
  0x59   :  { %548 = vmatpush.bf16.msrb.mxu1 %v1909_v26  ;;  %v1918_v26 = vld [vmem:[#allocation7 + $0x8] sm:$0xff] }
  0x5a   :  { %748 = vmatpush.bf16.msrb.mxu2 %v1918_v26  ;;  %v1729_v26 = vld [vmem:[#allocation2 + $0xa8] sm:$0xf0] }
  0x5c   :  { %495 = vmatmul.bf16.gmra.mxu1 %v2305_v27  ;;  %470 = vmatmul.bf16.gmra.mxu0 %v2314_v36 }
  0x5d   :  { %515 = vmatmul.bf16.gmra.mxu2 %v2346_v3 }
  0x5e   :  { %749 = vmatpush.bf16.msrb.mxu2 %v1917_v31  ;;  %v2390_v31 = vor.u32 %v1889_v25, %v1729_v26  ;;  %v1893_v26 = vld [vmem:[#allocation2 + $0xc4] sm:$0xf] }
  0x6c   :  { %500 = vmatmul.bf16.gmra.mxu1 %v2311_v33  ;;  %475 = vmatmul.bf16.gmra.mxu0 %v2320_v42 }
  0x6d   :  { %520 = vmatmul.bf16.gmra.mxu2 %v2356_v14 }
  0x7c   :  { %549 = vmatmul.bf16.vlgmr.msrb.gmra.mxu1 %v2317_v39  ;;  %480 = vmatmul.bf16.gmra.mxu0 %v2326_v48 }
  0x8c   :  { %554 = vmatmul.bf16.gmra.mxu1 %v2323_v45 }
  0x9c   :  { %559 = vmatmul.bf16.gmra.mxu1 %v2329_v51 }
  0xac   :  { %564 = vmatmul.bf16.gmra.mxu1 %v2335_v57 }
  0xb9   :  { %v2343_v0 = vpop.f32.mrf.mxu1  ;;  %v461_v29 = vpop.f32.mrf.mxu0 }
  0xba   :  { %v462_v50 = vadd.f32 %v2380_v49, %v461_v29 }
  0xbc   :  { %569 = vmatmul.bf16.gmra.mxu1 %v2341_v63 }
  0xc1   :  { %v2349_v4 = vpop.f32.mrf.mxu1  ;;  %v463_v38 = vpop.f32.mrf.mxu0 }
  0xc2   :  { %v464_v52 = vadd.f32 %v2380_v49, %v463_v38  ;;  %v1896_v38 = vld [vmem:[#allocation2 + $0xd4] sm:$0xf0] }
  0xc3   :  { %v2392_v41 = vor.u32 %v1896_v38, %v1751_v34 }
  0xc5   :  { %525 = vmatmul.bf16.vlgmr.msra.gmra.mxu3 %v2392_v41 }
  0xc9   :  { %v2353_v9 = vpop.f32.mrf.mxu1  ;;  %v466_v44 = vpop.f32.mrf.mxu0 }
  0xca   :  { %v467_v11 = vadd.f32 %v2380_v49, %v466_v44 }
  0xcc   :  { %574 = vmatmul.bf16.gmra.mxu1 %v2351_v8 }
  0xd1   :  { %v2359_v16 = vpop.f32.mrf.mxu1  ;;  %v468_v56 = vpop.f32.mrf.mxu0 }
  0xd2   :  { %v469_v12 = vadd.f32 %v2380_v49, %v468_v56 }
  0xd9   :  { %v2363_v24 = vpop.f32.mrf.mxu1  ;;  %v471_v7 = vpop.f32.mrf.mxu0 }
  0xda   :  { %v472_v43 = vadd.f32 %v2380_v49, %v471_v7  ;;  %v1898_v7 = vld [vmem:[#allocation2 + $0xe4] sm:$0xf0] }
  0xdc   :  { %579 = vmatmul.bf16.gmra.mxu1 %v2361_v23 }
  0xe1   :  { %v2366_v28 = vpop.f32.mrf.mxu1  ;;  %v473_v21 = vpop.f32.mrf.mxu0 }
  0xe9   :  { %v2370_v37 = vpop.f32.mrf.mxu1  ;;  %v476_v44 = vpop.f32.mrf.mxu0 }
  0xec   :  { %584 = vmatmul.bf16.gmra.mxu1 %v2368_v35 }
  0xf1   :  { %v2373_v40 = vpop.f32.mrf.mxu1  ;;  %v478_v1 = vpop.f32.mrf.mxu0 }
  0xf9   :  { %v550_v47 = vpop.f32.mrf.mxu1 }
  0xfa   :  { %v551_v53 = vadd.f32 %v550_v47, %v462_v50  ;;  %v474_v47 = vadd.f32 %v2380_v49, %v473_v21 }
  0xfc   :  { %589 = vmatmul.bf16.gmra.mxu1 %v2375_v46  ;;  %v630_v59 = vmax.f32 %v551_v53, 0.0 }
 0x101   :  { %v552_v55 = vpop.f32.mrf.mxu1 }
 0x102   :  { %v553_v58 = vadd.f32 %v552_v55, %v464_v52 }
 0x104   :  { %v631_v61 = vmax.f32 %v553_v58, 0.0  ;;  %v1891_v58 = vld [vmem:[#allocation2 + $0xb4] sm:$0xf] }
 0x106   :  { %v662_v2 = vpack.c.bf16 %v631_v61, %v630_v59  ;;  %v1737_v59 = vld [vmem:[#allocation2 + $0xb8] sm:$0xf0] }
 0x107   :  { %v2398_v62 = vor.u32 %v1891_v58, %v1737_v59 }
 0x108   :  { %750 = vmatmul.bf16.vlgmr.msrb.gmra.mxu2 %v662_v2 }
 0x109   :  { %v555_v6 = vpop.f32.mrf.mxu1 }
 0x10a   :  { %v556_v13 = vadd.f32 %v555_v6, %v467_v11  ;;  %v1759_v6 = vld [vmem:[#allocation2 + $0xe0] sm:$0xf] }
 0x10b   :  { %v2400_v11 = vor.u32 %v1898_v7, %v1759_v6  ;;  %v1753_v6 = vld [vmem:[#allocation2 + $0xd8] sm:$0xf0] }
 0x10c   :  { %594 = vmatmul.bf16.gmra.mxu1 %v2385_v5  ;;  %v632_v19 = vmax.f32 %v556_v13, 0.0  ;;  %v479_v13 = vadd.f32 %v2380_v49, %v478_v1 }
 0x10d   :  { %530 = vmatmul.bf16.gmra.mxu3 %v2400_v11 }
 0x111   :  { %v557_v15 = vpop.f32.mrf.mxu1 }
 0x112   :  { %v558_v18 = vadd.f32 %v557_v15, %v469_v12  ;;  %v477_v12 = vadd.f32 %v2380_v49, %v476_v44  ;;  %v1900_v44 = vld [vmem:[#allocation2 + $0xf4] sm:$0xf0] }
 0x114   :  { %v633_v20 = vmax.f32 %v558_v18, 0.0 }
 0x116   :  { %v663_v29 = vpack.c.bf16 %v633_v20, %v632_v19  ;;  %v481_v20 = vpop.f32.mrf.mxu0 }
 0x118   :  { %755 = vmatmul.bf16.gmra.mxu2 %v663_v29  ;;  %v1745_v29 = vld [vmem:[#allocation2 + $0xc8] sm:$0xf0] }
 0x119   :  { %v560_v32 = vpop.f32.mrf.mxu1  ;;  %v2406_v34 = vor.u32 %v1893_v26, %v1745_v29 }
 0x11a   :  { %v561_v50 = vadd.f32 %v560_v32, %v472_v43  ;;  %v1767_v43 = vld [vmem:[#allocation2 + $0xf0] sm:$0xf] }
 0x11c   :  { %599 = vmatmul.bf16.gmra.mxu1 %v2390_v31  ;;  %v634_v55 = vmax.f32 %v561_v50, 0.0  ;;  %v482_v50 = vadd.f32 %v2380_v49, %v481_v20 }
 0x121   :  { %v562_v52 = vpop.f32.mrf.mxu1 }
 0x122   :  { %v563_v53 = vadd.f32 %v562_v52, %v474_v47  ;;  %v2408_v47 = vor.u32 %v1900_v44, %v1767_v43  ;;  %v483_v52 = vpop.f32.mrf.mxu0  ;;  %v1761_v43 = vld [vmem:[#allocation2 + $0xe8] sm:$0xf0] }
 0x124   :  { %v635_v56 = vmax.f32 %v563_v53, 0.0  ;;  %535 = vmatmul.bf16.gmra.mxu3 %v2408_v47  ;;  %v2413_v53 = vpop.f32.mrf.mxu2 }
 0x126   :  { %v664_v61 = vpack.c.bf16 %v635_v56, %v634_v55  ;;  %v484_v55 = vadd.f32 %v2380_v49, %v483_v52 }
 0x128   :  { %760 = vmatmul.bf16.gmra.mxu2 %v664_v61 }
 0x129   :  { %v565_v2 = vpop.f32.mrf.mxu1 }
 0x12a   :  { %v566_v15 = vadd.f32 %v565_v2, %v477_v12  ;;  %v1895_v2 = vld [vmem:[#allocation2 + $0xd4] sm:$0xf] }
 0x12c   :  { %604 = vmatmul.bf16.gmra.mxu1 %v2398_v62  ;;  %v636_v21 = vmax.f32 %v566_v15, 0.0  ;;  %v508_v12 = vpop.f32.mrf.mxu2 }
 0x131   :  { %v567_v18 = vpop.f32.mrf.mxu1 }
 0x132   :  { %v568_v19 = vadd.f32 %v567_v18, %v479_v13  ;;  %v2416_v13 = vor.u32 %v1895_v2, %v1753_v6  ;;  %v487_v18 = vadd.f32 %v2380_v49, %v2343_v0  ;;  %v492_v0 = vadd.f32 %v2380_v49, %v2353_v9  ;;  %v1899_v6 = vld [vmem:[#allocation2 + $0xf4] sm:$0xf] }
 0x133   :  { %v497_v9 = vadd.f32 %v2380_v49, %v2363_v24 }
 0x134   :  { %v637_v25 = vmax.f32 %v568_v19, 0.0  ;;  %v489_v19 = vadd.f32 %v2380_v49, %v2349_v4  ;;  %v494_v4 = vadd.f32 %v2380_v49, %v2359_v16  ;;  %v499_v16 = vadd.f32 %v2380_v49, %v2366_v28 }
 0x136   :  { %v665_v32 = vpack.c.bf16 %v637_v25, %v636_v21  ;;  %v2423_v25 = vpop.f32.mrf.mxu2 }
 0x138   :  { %765 = vmatmul.bf16.gmra.mxu2 %v665_v32 }
 0x139   :  { %v570_v38 = vpop.f32.mrf.mxu1 }
 0x13a   :  { %v571_v56 = vadd.f32 %v570_v38, %v482_v50  ;;  %v1897_v38 = vld [vmem:[#allocation2 + $0xe4] sm:$0xf] }
 0x13b   :  { %v2425_v50 = vor.u32 %v1897_v38, %v1761_v43 }
 0x13c   :  { %609 = vmatmul.bf16.gmra.mxu1 %v2406_v34  ;;  %v638_v61 = vmax.f32 %v571_v56, 0.0 }
 0x141   :  { %v572_v58 = vpop.f32.mrf.mxu1 }
 0x142   :  { %v573_v59 = vadd.f32 %v572_v58, %v484_v55  ;;  %v513_v55 = vpop.f32.mrf.mxu2 }
 0x144   :  { %v639_v1 = vmax.f32 %v573_v59, 0.0 }
 0x146   :  { %v666_v7 = vpack.c.bf16 %v639_v1, %v638_v61 }
 0x148   :  { %770 = vmatmul.bf16.gmra.mxu2 %v666_v7  ;;  %v1769_v7 = vld [vmem:[#allocation2 + $0xf8] sm:$0xf0] }
 0x149   :  { %v575_v15 = vpop.f32.mrf.mxu1 }
 0x14a   :  { %v576_v20 = vadd.f32 %v575_v15, %v487_v18  ;;  %v516_v2 = vpop.f32.mrf.mxu2  ;;  %v2432_v18 = vor.u32 %v1899_v6, %v1769_v7 }
 0x14c   :  { %614 = vmatmul.bf16.gmra.mxu1 %v2416_v13  ;;  %v640_v29 = vmax.f32 %v576_v20, 0.0 }
 0x151   :  { %v577_v21 = vpop.f32.mrf.mxu1 }
 0x152   :  { %v578_v26 = vadd.f32 %v577_v21, %v489_v19  ;;  %v518_v20 = vpop.f32.mrf.mxu2 }
 0x154   :  { %v641_v32 = vmax.f32 %v578_v26, 0.0 }
 0x156   :  { %v667_v44 = vpack.c.bf16 %v641_v32, %v640_v29 }
 0x158   :  { %775 = vmatmul.bf16.gmra.mxu2 %v667_v44 }
 0x159   :  { %v580_v52 = vpop.f32.mrf.mxu1 }
 0x15a   :  { %v581_v56 = vadd.f32 %v580_v52, %v492_v0  ;;  %v521_v44 = vpop.f32.mrf.mxu2  ;;  %v502_v0 = vadd.f32 %v2380_v49, %v2370_v37 }
 0x15c   :  { %619 = vmatmul.bf16.gmra.mxu1 %v2425_v50  ;;  %v642_v61 = vmax.f32 %v581_v56, 0.0 }
 0x161   :  { %v582_v58 = vpop.f32.mrf.mxu1 }
 0x162   :  { %v583_v59 = vadd.f32 %v582_v58, %v494_v4  ;;  %v504_v4 = vadd.f32 %v2380_v49, %v2373_v40 }
 0x164   :  { %v643_v1 = vmax.f32 %v583_v59, 0.0  ;;  %v523_v59 = vpop.f32.mrf.mxu2 }
 0x166   :  { %v668_v15 = vpack.c.bf16 %v643_v1, %v642_v61 }
 0x168   :  { %780 = vmatmul.bf16.gmra.mxu2 %v668_v15  ;;  %v507_v15 = vadd.f32 %v2380_v49, %v2413_v53  ;;  %v512_v53 = vadd.f32 %v2380_v49, %v2423_v25  ;;  %v519_v25 = vadd.f32 %v2380_v49, %v518_v20  ;;  %v524_v20 = vadd.f32 %v2380_v49, %v523_v59 }
 0x169   :  { %v585_v19 = vpop.f32.mrf.mxu1 }
 0x16a   :  { %v586_v21 = vadd.f32 %v585_v19, %v497_v9  ;;  %v509_v19 = vadd.f32 %v2380_v49, %v508_v12  ;;  %v514_v12 = vadd.f32 %v2380_v49, %v513_v55 }
 0x16c   :  { %624 = vmatmul.bf16.gmra.mxu1 %v2432_v18  ;;  %v644_v32 = vmax.f32 %v586_v21, 0.0 }
 0x171   :  { %v587_v26 = vpop.f32.mrf.mxu1 }
 0x172   :  { %v588_v29 = vadd.f32 %v587_v26, %v499_v16 }
 0x174   :  { %v645_v38 = vmax.f32 %v588_v29, 0.0 }
 0x176   :  { %v669_v43 = vpack.c.bf16 %v645_v38, %v644_v32 }
 0x178   :  { %785 = vmatmul.bf16.gmra.mxu2 %v669_v43 }
 0x179   :  { %v590_v52 = vpop.f32.mrf.mxu1 }
 0x17a   :  { %v591_v24 = vadd.f32 %v590_v52, %v502_v0 }
 0x17c   :  { %v646_v28 = vmax.f32 %v591_v24, 0.0 }
 0x181   :  { %v592_v56 = vpop.f32.mrf.mxu1 }
 0x182   :  { %v593_v58 = vadd.f32 %v592_v56, %v504_v4 }
 0x184   :  { %v647_v61 = vmax.f32 %v593_v58, 0.0 }
 0x186   :  { %v670_v1 = vpack.c.bf16 %v647_v61, %v646_v28 }
 0x188   :  { %790 = vmatmul.bf16.gmra.mxu2 %v670_v1 }
 0x189   :  { %v595_v6 = vpop.f32.mrf.mxu1 }
 0x18a   :  { %v596_v37 = vadd.f32 %v595_v6, %v507_v15  ;;  %v517_v15 = vadd.f32 %v2380_v49, %v516_v2  ;;  %v522_v2 = vadd.f32 %v2380_v49, %v521_v44 }
 0x18b   :  { %v2443_v7 = vpop.f32.mrf.mxu2 }
 0x18c   :  { %v648_v21 = vmax.f32 %v596_v37, 0.0 }
 0x191   :  { %v597_v9 = vpop.f32.mrf.mxu1 }
 0x192   :  { %v598_v16 = vadd.f32 %v597_v9, %v509_v19 }
 0x193   :  { %v2448_v40 = vpop.f32.mrf.mxu2 }
 0x194   :  { %v649_v26 = vmax.f32 %v598_v16, 0.0 }
 0x196   :  { %v671_v32 = vpack.c.bf16 %v649_v26, %v648_v21 }
 0x198   :  { %795 = vmatmul.bf16.gmra.mxu2 %v671_v32 }
 0x199   :  { %v600_v38 = vpop.f32.mrf.mxu1 }
 0x19a   :  { %v601_v52 = vadd.f32 %v600_v38, %v512_v53 }
 0x19b   :  { %v2452_v43 = vpop.f32.mrf.mxu2 }
 0x19c   :  { %v650_v56 = vmax.f32 %v601_v52, 0.0 }
 0x1a1   :  { %v602_v0 = vpop.f32.mrf.mxu1 }
 0x1a2   :  { %v603_v4 = vadd.f32 %v602_v0, %v514_v12  ;;  %v526_v12 = vpop.f32.mrf.mxu3 }
 0x1a3   :  { %v2457_v24 = vpop.f32.mrf.mxu2 }
 0x1a4   :  { %v651_v58 = vmax.f32 %v603_v4, 0.0 }
 0x1a6   :  { %v672_v61 = vpack.c.bf16 %v651_v58, %v650_v56 }
 0x1a8   :  { %800 = vmatmul.bf16.gmra.mxu2 %v672_v61 }
 0x1a9   :  { %v605_v1 = vpop.f32.mrf.mxu1 }
 0x1aa   :  { %v606_v55 = vadd.f32 %v605_v1, %v517_v15  ;;  %v528_v15 = vpop.f32.mrf.mxu3 }
 0x1ab   :  { %v2461_v6 = vpop.f32.mrf.mxu2  ;;  %v529_v44 = vadd.f32 %v2380_v49, %v528_v15 }
 0x1ac   :  { %v652_v16 = vmax.f32 %v606_v55, 0.0 }
 0x1b1   :  { %v607_v19 = vpop.f32.mrf.mxu1 }
 0x1b2   :  { %v608_v37 = vadd.f32 %v607_v19, %v519_v25 }
 0x1b3   :  { %v2465_v9 = vpop.f32.mrf.mxu2 }
 0x1b4   :  { %v653_v21 = vmax.f32 %v608_v37, 0.0  ;;  %v833_v26 = vpack.c.bf16 %v2465_v9, %v2461_v6  ;;  %v527_v37 = vadd.f32 %v2380_v49, %v526_v12 }
 0x1b6   :  { %v673_v32 = vpack.c.bf16 %v653_v21, %v652_v16  ;;  %v531_v16 = vpop.f32.mrf.mxu3 }
 0x1b8   :  { %805 = vmatmul.bf16.gmra.mxu2 %v673_v32 }
 0x1b9   :  { %v610_v38 = vpop.f32.mrf.mxu1 }
 0x1ba   :  { %v611_v52 = vadd.f32 %v610_v38, %v522_v2 }
 0x1bb   :  { %v2469_v53 = vpop.f32.mrf.mxu2 }
 0x1bc   :  { %v654_v58 = vmax.f32 %v611_v52, 0.0 }
 0x1c1   :  { %v612_v0 = vpop.f32.mrf.mxu1 }
 0x1c2   :  { %v613_v4 = vadd.f32 %v612_v0, %v524_v20  ;;  %v533_v0 = vpop.f32.mrf.mxu3 }
 0x1c3   :  { %v768_v56 = vpop.f32.mrf.mxu2 }
 0x1c4   :  { %v655_v61 = vmax.f32 %v613_v4, 0.0  ;;  %v834_v1 = vpack.c.bf16 %v768_v56, %v2469_v53  ;;  %v532_v56 = vadd.f32 %v2380_v49, %v531_v16 }
 0x1c6   :  { %v674_v25 = vpack.c.bf16 %v655_v61, %v654_v58  ;;  %v534_v58 = vadd.f32 %v2380_v49, %v533_v0 }
 0x1c8   :  { %810 = vmatmul.bf16.gmra.mxu2 %v674_v25 }
 0x1c9   :  { %v615_v55 = vpop.f32.mrf.mxu1 }
 0x1ca   :  { %v616_v21 = vadd.f32 %v615_v55, %v527_v37  ;;  %v536_v29 = vpop.f32.mrf.mxu3 }
 0x1cb   :  { %v771_v19 = vpop.f32.mrf.mxu2 }
 0x1cc   :  { %v656_v2 = vmax.f32 %v616_v21, 0.0 }
 0x1d1   :  { %v617_v59 = vpop.f32.mrf.mxu1 }
 0x1d2   :  { %v618_v32 = vadd.f32 %v617_v59, %v529_v44 }
 0x1d3   :  { %v773_v38 = vpop.f32.mrf.mxu2 }
 0x1d4   :  { %v657_v20 = vmax.f32 %v618_v32, 0.0  ;;  %v537_v32 = vadd.f32 %v2380_v49, %v536_v29  ;;  %v835_v29 = vpack.c.bf16 %v773_v38, %v771_v19 }
 0x1d6   :  { %v675_v52 = vpack.c.bf16 %v657_v20, %v656_v2  ;;  %v538_v2 = vpop.f32.mrf.mxu3 }
 0x1d7   :  { %v539_v20 = vadd.f32 %v2380_v49, %v538_v2 }
 0x1d8   :  { %815 = vmatmul.bf16.gmra.mxu2 %v675_v52 }
 0x1d9   :  { %v620_v53 = vpop.f32.mrf.mxu1 }
 0x1da   :  { %v621_v61 = vadd.f32 %v620_v53, %v532_v56 }
 0x1db   :  { %v776_v4 = vpop.f32.mrf.mxu2 }
 0x1dc   :  { %v658_v55 = vmax.f32 %v621_v61, 0.0 }
 0x1e1   :  { %v622_v12 = vpop.f32.mrf.mxu1 }
 0x1e2   :  { %v623_v25 = vadd.f32 %v622_v12, %v534_v58 }
 0x1e3   :  { %v778_v15 = vpop.f32.mrf.mxu2 }
 0x1e4   :  { %v659_v37 = vmax.f32 %v623_v25, 0.0 }
 0x1e6   :  { %v676_v44 = vpack.c.bf16 %v659_v37, %v658_v55 }
 0x1e8   :  { %820 = vmatmul.bf16.gmra.mxu2 %v676_v44  ;;  %v836_v44 = vpack.c.bf16 %v778_v15, %v776_v4 }
 0x1e9   :  { %v625_v21 = vpop.f32.mrf.mxu1 }
 0x1ea   :  { %v626_v52 = vadd.f32 %v625_v21, %v537_v32  ;;  %v3128_v32 = vpack.c.bf16 %v2457_v24, %v2452_v43 }
 0x1eb   :  { %v781_v59 = vpop.f32.mrf.mxu2 }
 0x1ec   :  { %v660_v53 = vmax.f32 %v626_v52, 0.0 }
 0x1f1   :  { %v627_v16 = vpop.f32.mrf.mxu1 }
 0x1f2   :  { %v628_v28 = vadd.f32 %v627_v16, %v539_v20 }
 0x1f3   :  { %v783_v0 = vpop.f32.mrf.mxu2 }
 0x1f4   :  { %v661_v56 = vmax.f32 %v628_v28, 0.0  ;;  %v837_v55 = vpack.c.bf16 %v783_v0, %v781_v59  ;;  %v3129_v59 = vpack.c.bf16 %v2448_v40, %v2443_v7 }
 0x1f6   :  { %v677_v58 = vpack.c.bf16 %v661_v56, %v660_v53 }
 0x1f8   :  { %825 = vmatmul.bf16.gmra.mxu2 %v677_v58 }
 0x1fb   :  { %v786_v12 = vpop.f32.mrf.mxu2 }
 0x203   :  { %v788_v61 = vpop.f32.mrf.mxu2 }
 0x204   :  { %v838_v25 = vpack.c.bf16 %v788_v61, %v786_v12 }
 0x206   :  { %851 = vmatpush.bf16.msrb.mxu3 %v838_v25 }
 0x20a   :  { %852 = vmatpush.bf16.msrb.mxu3 %v837_v55 }
 0x20b   :  { %v791_v37 = vpop.f32.mrf.mxu2 }
 0x20e   :  { %853 = vmatpush.bf16.msrb.mxu3 %v836_v44 }
 0x212   :  { %854 = vmatpush.bf16.msrb.mxu3 %v835_v29 }
 0x213   :  { %v793_v49 = vpop.f32.mrf.mxu2 }
 0x214   :  { %v839_v21 = vpack.c.bf16 %v793_v49, %v791_v37 }
 0x216   :  { %855 = vmatpush.bf16.msrb.mxu3 %v834_v1 }
 0x21a   :  { %856 = vmatpush.bf16.msrb.mxu3 %v833_v26 }
 0x21b   :  { %v796_v28 = vpop.f32.mrf.mxu2 }
 0x21e   :  { %857 = vmatpush.bf16.msrb.mxu3 %v3128_v32 }
 0x222   :  { %858 = vmatpush.bf16.msrb.mxu3 %v3129_v59 }
 0x223   :  { %v798_v4 = vpop.f32.mrf.mxu2 }
 0x224   :  { %v840_v15 = vpack.c.bf16 %v798_v4, %v796_v28 }
 0x225   :  { %859 = vmatmul.bf16.vlgmr.msrb.gmra.mxu3 %v2302_v22 }
 0x22b   :  { %v801_v19 = vpop.f32.mrf.mxu2 }
 0x233   :  { %v803_v38 = vpop.f32.mrf.mxu2 }
 0x234   :  { %v841_v1 = vpack.c.bf16 %v803_v38, %v801_v19 }
 0x235   :  { %864 = vmatmul.bf16.gmra.mxu3 %v2308_v30 }
 0x23b   :  { %v806_v6 = vpop.f32.mrf.mxu2 }
 0x243   :  { %v808_v9 = vpop.f32.mrf.mxu2 }
 0x244   :  { %v842_v26 = vpack.c.bf16 %v808_v9, %v806_v6 }
 0x245   :  { %869 = vmatmul.bf16.gmra.mxu3 %v2314_v36 }
 0x24b   :  { %v811_v43 = vpop.f32.mrf.mxu2 }
 0x253   :  { %v813_v24 = vpop.f32.mrf.mxu2 }
 0x254   :  { %v843_v0 = vpack.c.bf16 %v813_v24, %v811_v43 }
 0x255   :  { %874 = vmatmul.bf16.gmra.mxu3 %v2320_v42  ;;  %v2514_v42 = vld [vmem:[%s3062_s4] ss:$0 sm:$0xff] }
 0x25b   :  { %v816_v7 = vpop.f32.mrf.mxu2 }
 0x263   :  { %v818_v40 = vpop.f32.mrf.mxu2 }
 0x264   :  { %v844_v36 = vpack.c.bf16 %v818_v40, %v816_v7 }
 0x265   :  { %879 = vmatmul.bf16.gmra.mxu3 %v2326_v48 }
 0x26b   :  { %v821_v2 = vpop.f32.mrf.mxu2 }
 0x273   :  { %v823_v22 = vpop.f32.mrf.mxu2 }
 0x274   :  { %v845_v16 = vpack.c.bf16 %v823_v22, %v821_v2 }
 0x275   :  { %884 = vmatmul.bf16.gmra.mxu3 %v2296_v10 }
 0x27b   :  { %v826_v20 = vpop.f32.mrf.mxu2 }
 0x283   :  { %v828_v52 = vpop.f32.mrf.mxu2 }
 0x284   :  { %v846_v30 = vpack.c.bf16 %v828_v52, %v826_v20 }
 0x285   :  { %889 = vmatmul.bf16.gmra.mxu3 %v2299_v17 }
 0x286   :  { %940 = vmatpush.bf16.msrb.mxu0 %v846_v30 }
 0x28a   :  { %941 = vmatpush.bf16.msrb.mxu0 %v845_v16 }
 0x28e   :  { %942 = vmatpush.bf16.msrb.mxu0 %v844_v36 }
 0x292   :  { %943 = vmatpush.bf16.msrb.mxu0 %v843_v0 }
 0x295   :  { %894 = vmatmul.bf16.gmra.mxu3 %v2305_v27 }
 0x296   :  { %944 = vmatpush.bf16.msrb.mxu0 %v842_v26 }
 0x29a   :  { %945 = vmatpush.bf16.msrb.mxu0 %v841_v1 }
 0x29e   :  { %946 = vmatpush.bf16.msrb.mxu0 %v840_v15 }
 0x2a2   :  { %947 = vmatpush.bf16.msrb.mxu0 %v839_v21 }
 0x2a5   :  { %948 = vmatmul.bf16.vlgmr.msrb.gmra.mxu0 %v2317_v39  ;;  %899 = vmatmul.bf16.gmra.mxu3 %v2311_v33 }
 0x2a8   :  { %v860_v10 = vpop.f32.mrf.mxu3 }
 0x2b0   :  { %v862_v17 = vpop.f32.mrf.mxu3 }
 0x2b5   :  { %953 = vmatmul.bf16.gmra.mxu0 %v2323_v45  ;;  %904 = vmatmul.bf16.gmra.mxu3 %v2332_v54  ;;  %v861_v45 = vadd.f32 %v2514_v42, %v860_v10 }
 0x2b8   :  { %v865_v27 = vpop.f32.mrf.mxu3 }
 0x2c0   :  { %v867_v33 = vpop.f32.mrf.mxu3 }
 0x2c1   :  { %v868_v58 = vadd.f32 %v2514_v42, %v867_v33 }
 0x2c5   :  { %958 = vmatmul.bf16.gmra.mxu0 %v2329_v51  ;;  %909 = vmatmul.bf16.gmra.mxu3 %v2338_v60  ;;  %v2521_v51 = vld [vmem:[%s3063_s5] ss:$0 sm:$0xff] }
 0x2c8   :  { %v870_v39 = vpop.f32.mrf.mxu3 }
 0x2d0   :  { %v872_v48 = vpop.f32.mrf.mxu3 }
 0x2d1   :  { %v873_v49 = vadd.f32 %v2514_v42, %v872_v48 }
 0x2d5   :  { %963 = vmatmul.bf16.gmra.mxu0 %v2335_v57  ;;  %914 = vmatmul.bf16.gmra.mxu3 %v2346_v3  ;;  %v863_v3 = vadd.f32 %v2514_v42, %v862_v17 }
 0x2e5   :  { %968 = vmatmul.bf16.gmra.mxu0 %v2341_v63  ;;  %919 = vmatmul.bf16.gmra.mxu3 %v2356_v14  ;;  %v875_v63 = vpop.f32.mrf.mxu3 }
 0x2e6   :  { %v876_v59 = vadd.f32 %v2514_v42, %v875_v63 }
 0x2f5   :  { %973 = vmatmul.bf16.gmra.mxu0 %v2351_v8  ;;  %924 = vmatmul.bf16.gmra.mxu3 %v2392_v41  ;;  %v877_v41 = vpop.f32.mrf.mxu3 }
 0x2f6   :  { %v878_v1 = vadd.f32 %v2514_v42, %v877_v41 }
 0x2fd   :  { %v880_v56 = vpop.f32.mrf.mxu3 }
 0x2fe   :  { %v881_v43 = vadd.f32 %v2514_v42, %v880_v56 }
 0x305   :  { %978 = vmatmul.bf16.gmra.mxu0 %v2361_v23  ;;  %929 = vmatmul.bf16.gmra.mxu3 %v2400_v11  ;;  %v882_v55 = vpop.f32.mrf.mxu3 }
 0x306   :  { %v883_v2 = vadd.f32 %v2514_v42, %v882_v55 }
 0x30d   :  { %v885_v29 = vpop.f32.mrf.mxu3 }
 0x30e   :  { %v886_v16 = vadd.f32 %v2514_v42, %v885_v29 }
 0x315   :  { %983 = vmatmul.bf16.gmra.mxu0 %v2368_v35  ;;  %v866_v35 = vadd.f32 %v2514_v42, %v865_v27  ;;  %934 = vmatmul.bf16.gmra.mxu3 %v2408_v47  ;;  %v871_v47 = vadd.f32 %v2514_v42, %v870_v39  ;;  %v887_v4 = vpop.f32.mrf.mxu3 }
 0x316   :  { %v888_v17 = vadd.f32 %v2514_v42, %v887_v4 }
 0x31d   :  { %v890_v38 = vpop.f32.mrf.mxu3 }
 0x322   :  { %v949_v54 = vpop.f32.mrf.mxu0 }
 0x323   :  { %v2523_v57 = vadd.f32 %v949_v54, %v861_v45  ;;  %v891_v45 = vadd.f32 %v2514_v42, %v890_v38 }
 0x325   :  { %3130 = vst [vmem:[#allocation19_spill] sm:$0xff] %v2523_v57  ;;  %988 = vmatmul.bf16.gmra.mxu0 %v2375_v46  ;;  %v1084_v60 = vmul.f32 %v2521_v51, %v2523_v57  ;;  %v892_v7 = vpop.f32.mrf.mxu3 }
 0x326   :  { %v893_v63 = vadd.f32 %v2514_v42, %v892_v7 }
 0x327   :  { %1116 = vadd.xlane.f32.xlu0 %v1084_v60 }
 0x32a   :  { %v951_v8 = vpop.f32.mrf.mxu0 }
 0x32b   :  { %v2529_v14 = vadd.f32 %v951_v8, %v863_v3 }
 0x32d   :  { %3131 = vst [vmem:[#allocation20_spill] sm:$0xff] %v2529_v14  ;;  %v1085_v23 = vmul.f32 %v2521_v51, %v2529_v14  ;;  %v895_v52 = vpop.f32.mrf.mxu3 }
 0x32e   :  { %v896_v41 = vadd.f32 %v2514_v42, %v895_v52 }
 0x32f   :  { %1118 = vadd.xlane.f32.xlu0 %v1085_v23 }
 0x332   :  { %v954_v46 = vpop.f32.mrf.mxu0 }
 0x333   :  { %v2535_v11 = vadd.f32 %v954_v46, %v866_v35 }
 0x335   :  { %3132 = vst [vmem:[#allocation21_spill] sm:$0xff] %v2535_v11  ;;  %993 = vmatmul.bf16.gmra.mxu0 %v2385_v5  ;;  %v1086_v53 = vmul.f32 %v2521_v51, %v2535_v11  ;;  %v897_v10 = vpop.f32.mrf.mxu3  ;;  %v2763_v11 = vld [vmem:[#allocation10 + $0x48] sm:$0xff] }
 0x336   :  { %vm1189_vm9 = vcmp.gt.f32.partialorder %v2763_v11, 0.0 }
 0x337   :  { %1120 = vadd.xlane.f32.xlu1 %v1086_v53 }
 0x33a   :  { %v956_v12 = vpop.f32.mrf.mxu0 }
 0x33b   :  { %v2541_v61 = vadd.f32 %v956_v12, %v868_v58  ;;  %v898_v58 = vadd.f32 %v2514_v42, %v897_v10 }
 0x33d   :  { %3133 = vst [vmem:[#allocation22_spill] sm:$0xff] %v2541_v61  ;;  %v1087_v25 = vmul.f32 %v2521_v51, %v2541_v61  ;;  %v900_v48 = vpop.f32.mrf.mxu3 }
 0x33f   :  { %1122 = vadd.xlane.f32.xlu1 %v1087_v25 }
 0x342   :  { %v959_v37 = vpop.f32.mrf.mxu0 }
 0x343   :  { %v2546_v44 = vadd.f32 %v959_v37, %v871_v47  ;;  %v901_v37 = vadd.f32 %v2514_v42, %v900_v48 }
 0x345   :  { %3134 = vst [vmem:[#allocation23_spill] sm:$0xff] %v2546_v44  ;;  %998 = vmatmul.bf16.gmra.mxu0 %v2390_v31  ;;  %v1088_v5 = vmul.f32 %v2521_v51, %v2546_v44  ;;  %v902_v8 = vpop.f32.mrf.mxu3  ;;  %v2771_v44 = vld [vmem:[#allocation10 + $0x58] sm:$0xff] }
 0x346   :  { %vm1191_vm11 = vcmp.gt.f32.partialorder %v2771_v44, 0.0 }
 0x347   :  { %1124 = vadd.xlane.f32.xlu2 %v1088_v5 }
 0x34a   :  { %v961_v21 = vpop.f32.mrf.mxu0 }
 0x34b   :  { %v2552_v28 = vadd.f32 %v961_v21, %v873_v49  ;;  %v903_v21 = vadd.f32 %v2514_v42, %v902_v8 }
 0x34d   :  { %3135 = vst [vmem:[#allocation24_spill] sm:$0xff] %v2552_v28  ;;  %v1089_v32 = vmul.f32 %v2521_v51, %v2552_v28 }
 0x34f   :  { %1126 = vadd.xlane.f32.xlu2 %v1089_v32 }
 0x352   :  { %v964_v15 = vpop.f32.mrf.mxu0 }
 0x353   :  { %v2557_v19 = vadd.f32 %v964_v15, %v876_v59 }
 0x355   :  { %3136 = vst [vmem:[#allocation25_spill] sm:$0xff] %v2557_v19  ;;  %1003 = vmatmul.bf16.gmra.mxu0 %v2398_v62  ;;  %v1090_v31 = vmul.f32 %v2521_v51, %v2557_v19 }
 0x357   :  { %1128 = vadd.xlane.f32.xlu0 %v1090_v31 }
 0x35a   :  { %v966_v6 = vpop.f32.mrf.mxu0 }
 0x35b   :  { %v2563_v9 = vadd.f32 %v966_v6, %v878_v1 }
 0x35d   :  { %3137 = vst [vmem:[#allocation26_spill] sm:$0xff] %v2563_v9  ;;  %v1091_v26 = vmul.f32 %v2521_v51, %v2563_v9 }
 0x35f   :  { %1130 = vadd.xlane.f32.xlu1 %v1091_v26 }
 0x362   :  { %v969_v24 = vpop.f32.mrf.mxu0 }
 0x363   :  { %v2568_v40 = vadd.f32 %v969_v24, %v881_v43 }
 0x365   :  { %3138 = vst [vmem:[#allocation27_spill] sm:$0xff] %v2568_v40  ;;  %1008 = vmatmul.bf16.gmra.mxu0 %v2406_v34  ;;  %v1092_v62 = vmul.f32 %v2521_v51, %v2568_v40  ;;  %v2802_v40 = vld [vmem:[#allocation10 + $0x88] sm:$0xff] }
 0x367   :  { %1132 = vadd.xlane.f32.xlu2 %v1092_v62 }
 0x36a   :  { %v971_v22 = vpop.f32.mrf.mxu0 }
 0x36b   :  { %v2574_v20 = vadd.f32 %v971_v22, %v883_v2 }
 0x36d   :  { %3139 = vst [vmem:[#allocation28_spill] sm:$0xff] %v2574_v20  ;;  %v1093_v30 = vmul.f32 %v2521_v51, %v2574_v20 }
 0x36f   :  { %1134 = vadd.xlane.f32.xlu0 %v1093_v30 }
 0x372   :  { %v974_v36 = vpop.f32.mrf.mxu0 }
 0x373   :  { %v2579_v0 = vadd.f32 %v974_v36, %v886_v16 }
 0x375   :  { %3140 = vst [vmem:[#allocation29_spill] sm:$0xff] %v2579_v0  ;;  %1013 = vmatmul.bf16.gmra.mxu0 %v2416_v13  ;;  %v1094_v34 = vmul.f32 %v2521_v51, %v2579_v0  ;;  %v2809_v0 = vld [vmem:[#allocation10 + $0x90] sm:$0xff] }
 0x377   :  { %1136 = vadd.xlane.f32.xlu1 %v1094_v34 }
 0x37a   :  { %v976_v27 = vpop.f32.mrf.mxu0 }
 0x37b   :  { %v2585_v33 = vadd.f32 %v976_v27, %v888_v17 }
 0x37d   :  { %3141 = vst [vmem:[#allocation30_spill] sm:$0xff] %v2585_v33  ;;  %v1095_v39 = vmul.f32 %v2521_v51, %v2585_v33 }
 0x37f   :  { %1138 = vadd.xlane.f32.xlu2 %v1095_v39 }
 0x382   :  { %v979_v54 = vpop.f32.mrf.mxu0 }
 0x383   :  { %v2590_v60 = vadd.f32 %v979_v54, %v891_v45 }
 0x385   :  { %3142 = vst [vmem:[#allocation31_spill] sm:$0xff] %v2590_v60  ;;  %1018 = vmatmul.bf16.gmra.mxu0 %v2425_v50  ;;  %v1096_v13 = vmul.f32 %v2521_v51, %v2590_v60  ;;  %v905_v50 = vpop.f32.mrf.mxu3 }
 0x386   :  { %v906_v15 = vadd.f32 %v2514_v42, %v905_v50 }
 0x387   :  { %1140 = vadd.xlane.f32.xlu0 %v1096_v13 }
 0x38a   :  { %v981_v3 = vpop.f32.mrf.mxu0 }
 0x38b   :  { %v2596_v23 = vadd.f32 %v981_v3, %v893_v63 }
 0x38d   :  { %3143 = vst [vmem:[#allocation32_spill] sm:$0xff] %v2596_v23  ;;  %v1097_v35 = vmul.f32 %v2521_v51, %v2596_v23  ;;  %v907_v55 = vpop.f32.mrf.mxu3 }
 0x38e   :  { %v908_v26 = vadd.f32 %v2514_v42, %v907_v55 }
 0x38f   :  { %1142 = vadd.xlane.f32.xlu1 %v1097_v35 }
 0x392   :  { %v984_v46 = vpop.f32.mrf.mxu0 }
 0x393   :  { %v2601_v53 = vadd.f32 %v984_v46, %v896_v41 }
 0x395   :  { %3144 = vst [vmem:[#allocation33_spill] sm:$0xff] %v2601_v53  ;;  %1023 = vmatmul.bf16.gmra.mxu0 %v2432_v18  ;;  %v1098_v56 = vmul.f32 %v2521_v51, %v2601_v53  ;;  %v910_v49 = vpop.f32.mrf.mxu3 }
 0x396   :  { %v911_v2 = vadd.f32 %v2514_v42, %v910_v49 }
 0x397   :  { %1144 = vadd.xlane.f32.xlu2 %v1098_v56 }
 0x39a   :  { %v986_v12 = vpop.f32.mrf.mxu0 }
 0x39b   :  { %v2607_v25 = vadd.f32 %v986_v12, %v898_v58 }
 0x39d   :  { %3145 = vst [vmem:[#allocation34_spill] sm:$0xff] %v2607_v25  ;;  %v1099_v47 = vmul.f32 %v2521_v51, %v2607_v25  ;;  %v912_v38 = vpop.f32.mrf.mxu3 }
 0x39e   :  { %v913_v36 = vadd.f32 %v2514_v42, %v912_v38 }
 0x39f   :  { %1146 = vadd.xlane.f32.xlu0 %v1099_v47 }
 0x3a2   :  { %v989_v5 = vpop.f32.mrf.mxu0 }
 0x3a3   :  { %v2612_v29 = vadd.f32 %v989_v5, %v901_v37 }
 0x3a5   :  { %3146 = vst [vmem:[#allocation35_spill] sm:$0xff] %v2612_v29  ;;  %v1100_v18 = vmul.f32 %v2521_v51, %v2612_v29  ;;  %v915_v7 = vpop.f32.mrf.mxu3 }
 0x3a6   :  { %v916_v27 = vadd.f32 %v2514_v42, %v915_v7 }
 0x3a7   :  { %1148 = vadd.xlane.f32.xlu1 %v1100_v18 }
 0x3aa   :  { %v991_v32 = vpop.f32.mrf.mxu0 }
 0x3ab   :  { %v2617_v59 = vadd.f32 %v991_v32, %v903_v21 }
 0x3ad   :  { %3147 = vst [vmem:[#allocation36_spill] sm:$0xff] %v2617_v59  ;;  %v1101_v4 = vmul.f32 %v2521_v51, %v2617_v59  ;;  %v917_v16 = vpop.f32.mrf.mxu3  ;;  %v2769_v59 = vld [vmem:[#allocation10 + $0x50] sm:$0xff] }
 0x3ae   :  { %v918_v13 = vadd.f32 %v2514_v42, %v917_v16  ;;  %vm1190_vm10 = vcmp.gt.f32.partialorder %v2769_v59, 0.0 }
 0x3af   :  { %1150 = vadd.xlane.f32.xlu2 %v1101_v4 }
 0x3b2   :  { %v994_v31 = vpop.f32.mrf.mxu0 }
 0x3b3   :  { %v2622_v1 = vadd.f32 %v994_v31, %v906_v15 }
 0x3b5   :  { %3148 = vst [vmem:[#allocation37_spill] sm:$0xff] %v2622_v1  ;;  %v1102_v6 = vmul.f32 %v2521_v51, %v2622_v1  ;;  %v920_v39 = vpop.f32.mrf.mxu3 }
 0x3b6   :  { %v921_v41 = vadd.f32 %v2514_v42, %v920_v39 }
 0x3b7   :  { %1152 = vadd.xlane.f32.xlu0 %v1102_v6 }
 0x3ba   :  { %v996_v43 = vpop.f32.mrf.mxu0 }
 0x3bb   :  { %v2627_v24 = vadd.f32 %v996_v43, %v908_v26 }
 0x3bd   :  { %3149 = vst [vmem:[#allocation38_spill] sm:$0xff] %v2627_v24  ;;  %v1103_v62 = vmul.f32 %v2521_v51, %v2627_v24  ;;  %v922_v3 = vpop.f32.mrf.mxu3  ;;  %v2787_v24 = vld [vmem:[#allocation10 + $0x70] sm:$0xff] }
 0x3be   :  { %v923_v12 = vadd.f32 %v2514_v42, %v922_v3  ;;  %vm1194_vm14 = vcmp.gt.f32.partialorder %v2787_v24, 0.0 }
 0x3bf   :  { %1154 = vadd.xlane.f32.xlu1 %v1103_v62 }
 0x3c2   :  { %v999_v22 = vpop.f32.mrf.mxu0 }
 0x3c3   :  { %v2632_v52 = vadd.f32 %v999_v22, %v911_v2 }
 0x3c5   :  { %3150 = vst [vmem:[#allocation39_spill] sm:$0xff] %v2632_v52  ;;  %v1104_v30 = vmul.f32 %v2521_v51, %v2632_v52  ;;  %v925_v56 = vpop.f32.mrf.mxu3  ;;  %v2792_v52 = vld [vmem:[#allocation10 + $0x78] sm:$0xff] }
 0x3c6   :  { %v926_v18 = vadd.f32 %v2514_v42, %v925_v56  ;;  %v2695_v56 = vpop.xlane.xlu2 %1124  ;;  %vm1195_vm15 = vcmp.gt.f32.partialorder %v2792_v52, 0.0 }
 0x3c7   :  { %1156 = vadd.xlane.f32.xlu2 %v1104_v30  ;;  %3164 = vst [vmem:[#allocation53_spill] sm:$0xff] %v2695_v56 }
 0x3ca   :  { %v1001_v34 = vpop.f32.mrf.mxu0 }
 0x3cb   :  { %v2637_v10 = vadd.f32 %v1001_v34, %v913_v36 }
 0x3cd   :  { %3151 = vst [vmem:[#allocation40_spill] sm:$0xff] %v2637_v10  ;;  %v1105_v17 = vmul.f32 %v2521_v51, %v2637_v10  ;;  %v927_v5 = vpop.f32.mrf.mxu3 }
 0x3ce   :  { %v928_v15 = vadd.f32 %v2514_v42, %v927_v5 }
 0x3cf   :  { %1158 = vadd.xlane.f32.xlu0 %v1105_v17 }
 0x3d2   :  { %v1004_v45 = vpop.f32.mrf.mxu0 }
 0x3d3   :  { %v2642_v48 = vadd.f32 %v1004_v45, %v916_v27 }
 0x3d5   :  { %3152 = vst [vmem:[#allocation41_spill] sm:$0xff] %v2642_v48  ;;  %v1106_v54 = vmul.f32 %v2521_v51, %v2642_v48  ;;  %v930_v4 = vpop.f32.mrf.mxu3 }
 0x3d6   :  { %v931_v26 = vadd.f32 %v2514_v42, %v930_v4 }
 0x3d7   :  { %1160 = vadd.xlane.f32.xlu1 %v1106_v54 }
 0x3da   :  { %v1006_v63 = vpop.f32.mrf.mxu0 }
 0x3db   :  { %v2647_v8 = vadd.f32 %v1006_v63, %v918_v13 }
 0x3dd   :  { %3153 = vst [vmem:[#allocation42_spill] sm:$0xff] %v2647_v8  ;;  %v1107_v35 = vmul.f32 %v2521_v51, %v2647_v8  ;;  %v932_v43 = vpop.f32.mrf.mxu3 }
 0x3de   :  { %v933_v22 = vadd.f32 %v2514_v42, %v932_v43 }
 0x3df   :  { %1162 = vadd.xlane.f32.xlu2 %v1107_v35 }
 0x3e2   :  { %v1009_v46 = vpop.f32.mrf.mxu0 }
 0x3e3   :  { %v2652_v50 = vadd.f32 %v1009_v46, %v921_v41  ;;  %v2691_v41 = vpop.xlane.xlu0 %1116  ;;  %v2693_v46 = vpop.xlane.xlu1 %1120 }
 0x3e4   :  { %3162 = vst [vmem:[#allocation51_spill] sm:$0xff] %v2691_v41 }
 0x3e5   :  { %3154 = vst [vmem:[#allocation43_spill] sm:$0xff] %v2652_v50  ;;  %v1108_v58 = vmul.f32 %v2521_v51, %v2652_v50  ;;  %v935_v36 = vpop.f32.mrf.mxu3 }
 0x3e6   :  { %v936_v17 = vadd.f32 %v2514_v42, %v935_v36  ;;  %3163 = vst [vmem:[#allocation52_spill] sm:$0xff] %v2693_v46 }
 0x3e7   :  { %1164 = vadd.xlane.f32.xlu0 %v1108_v58 }
 0x3ea   :  { %v1011_v47 = vpop.f32.mrf.mxu0 }
 0x3eb   :  { %v2657_v55 = vadd.f32 %v1011_v47, %v923_v12  ;;  %v2697_v58 = vpop.xlane.xlu0 %1118  ;;  %v2699_v12 = vpop.xlane.xlu1 %1122 }
 0x3ec   :  { %3165 = vst [vmem:[#allocation54_spill] sm:$0xff] %v2697_v58  ;;  %v2701_v47 = vpop.xlane.xlu2 %1126 }
 0x3ed   :  { %3155 = vst [vmem:[#allocation44_spill] sm:$0xff] %v2657_v55  ;;  %v1109_v37 = vmul.f32 %v2521_v51, %v2657_v55  ;;  %v937_v54 = vpop.f32.mrf.mxu3  ;;  %v2821_v55 = vld [vmem:[#allocation10 + $0xa8] sm:$0xff] }
 0x3ee   :  { %v938_v13 = vadd.f32 %v2514_v42, %v937_v54  ;;  %3166 = vst [vmem:[#allocation55_spill] sm:$0xff] %v2699_v12  ;;  %v2750_v54 = vld [vmem:[#allocation10 + $0x30] sm:$0xff] }
 0x3ef   :  { %1166 = vadd.xlane.f32.xlu1 %v1109_v37  ;;  %3167 = vst [vmem:[#allocation56_spill] sm:$0xff] %v2701_v47  ;;  %vm1186_vm6 = vcmp.gt.f32.partialorder %v2750_v54, 0.0 }
 0x3f2   :  { %v1014_v49 = vpop.f32.mrf.mxu0 }
 0x3f3   :  { %v2662_v21 = vadd.f32 %v1014_v49, %v926_v18  ;;  %v2703_v42 = vpop.xlane.xlu0 %1128  ;;  %v2705_v37 = vpop.xlane.xlu1 %1130 }
 0x3f4   :  { %3168 = vst [vmem:[#allocation57_spill] sm:$0xff] %v2703_v42  ;;  %v2707_v5 = vpop.xlane.xlu2 %1132 }
 0x3f5   :  { %3156 = vst [vmem:[#allocation45_spill] sm:$0xff] %v2662_v21  ;;  %v1110_v32 = vmul.f32 %v2521_v51, %v2662_v21 }
 0x3f6   :  { %3169 = vst [vmem:[#allocation58_spill] sm:$0xff] %v2705_v37 }
 0x3f7   :  { %1168 = vadd.xlane.f32.xlu2 %v1110_v32  ;;  %3170 = vst [vmem:[#allocation59_spill] sm:$0xff] %v2707_v5 }
 0x3fa   :  { %v1016_v31 = vpop.f32.mrf.mxu0 }
 0x3fb   :  { %v2667_v38 = vadd.f32 %v1016_v31, %v928_v15  ;;  %v2711_v18 = vpop.xlane.xlu1 %1136 }
 0x3fc   :  { %3172 = vst [vmem:[#allocation61_spill] sm:$0xff] %v2711_v18  ;;  %v2713_v49 = vpop.xlane.xlu2 %1138 }
 0x3fd   :  { %3157 = vst [vmem:[#allocation46_spill] sm:$0xff] %v2667_v38  ;;  %v1111_v6 = vmul.f32 %v2521_v51, %v2667_v38  ;;  %v1223_v8 = vsel %vm1191_vm11, %v2713_v49, -1e+30 }
 0x3fe   :  { %3173 = vst [vmem:[#allocation62_spill] sm:$0xff] %v2713_v49 }
 0x3ff   :  { %1170 = vadd.xlane.f32.xlu0 %v1111_v6 }
 0x402   :  { %v1019_v7 = vpop.f32.mrf.mxu0 }
 0x403   :  { %v2672_v62 = vadd.f32 %v1019_v7, %v931_v26  ;;  %v2717_v4 = vpop.xlane.xlu1 %1142 }
 0x404   :  { %3175 = vst [vmem:[#allocation64_spill] sm:$0xff] %v2717_v4 }
 0x405   :  { %3158 = vst [vmem:[#allocation47_spill] sm:$0xff] %v2672_v62  ;;  %v1112_v2 = vmul.f32 %v2521_v51, %v2672_v62 }
 0x407   :  { %1172 = vadd.xlane.f32.xlu1 %v1112_v2 }
 0x40a   :  { %v1021_v30 = vpop.f32.mrf.mxu0  ;;  %v2719_v15 = vpop.xlane.xlu2 %1144 }
 0x40b   :  { %v2677_v16 = vadd.f32 %v1021_v30, %v933_v22  ;;  %3176 = vst [vmem:[#allocation65_spill] sm:$0xff] %v2719_v15  ;;  %v2733_v22 = vld [vmem:[#allocation10] sm:$0xff]  ;;  %v2735_v30 = vld [vmem:[#allocation10 + $0x8] sm:$0xff] }
 0x40c   :  { %vm1180_vm0 = vcmp.gt.f32.partialorder %v2733_v22, 0.0  ;;  %vm1181_vm1 = vcmp.gt.f32.partialorder %v2735_v30, 0.0 }
 0x40d   :  { %3159 = vst [vmem:[#allocation48_spill] sm:$0xff] %v2677_v16  ;;  %v1113_v34 = vmul.f32 %v2521_v51, %v2677_v16  ;;  %v1212_v57 = vsel %vm1180_vm0, %v2691_v41, -1e+30  ;;  %v1213_v14 = vsel %vm1181_vm1, %v2697_v58, -1e+30  ;;  %v2776_v41 = vld [vmem:[#allocation10 + $0x60] sm:$0xff] }
 0x40e   :  { %v2778_v58 = vld [vmem:[#allocation10 + $0x68] sm:$0xff]  ;;  %vm1192_vm12 = vcmp.gt.f32.partialorder %v2776_v41, 0.0  ;;  %vm1197_vm1 = vcmp.gt.f32.partialorder %v2802_v40, 0.0 }
 0x40f   :  { %1174 = vadd.xlane.f32.xlu2 %v1113_v34  ;;  %v2739_v34 = vld [vmem:[#allocation10 + $0x10] sm:$0xff]  ;;  %vm1193_vm13 = vcmp.gt.f32.partialorder %v2778_v58, 0.0 }
 0x410   :  { %vm1182_vm2 = vcmp.gt.f32.partialorder %v2739_v34, 0.0 }
 0x411   :  { %v1214_v29 = vsel %vm1182_vm2, %v2693_v46, -1e+30  ;;  %vm1198_vm2 = vcmp.gt.f32.partialorder %v2809_v0, 0.0 }
 0x412   :  { %v1024_v27 = vpop.f32.mrf.mxu0 }
 0x413   :  { %v2682_v39 = vadd.f32 %v1024_v27, %v936_v17  ;;  %v2741_v17 = vld [vmem:[#allocation10 + $0x18] sm:$0xff]  ;;  %v2743_v27 = vld [vmem:[#allocation10 + $0x20] sm:$0xff] }
 0x414   :  { %vm1183_vm3 = vcmp.gt.f32.partialorder %v2741_v17, 0.0  ;;  %vm1184_vm4 = vcmp.gt.f32.partialorder %v2743_v27, 0.0 }
 0x415   :  { %3160 = vst [vmem:[#allocation49_spill] sm:$0xff] %v2682_v39  ;;  %v1114_v45 = vmul.f32 %v2521_v51, %v2682_v39  ;;  %v1215_v1 = vsel %vm1183_vm3, %v2699_v12, -1e+30  ;;  %v1216_v46 = vsel %vm1184_vm4, %v2695_v56, -1e+30 }
 0x416   :  { %v1218_v12 = vsel %vm1186_vm6, %v2703_v42, -1e+30  ;;  %v1244_v56 = vmax.f32 %v1212_v57, %v1216_v46  ;;  %v2800_v42 = vld [vmem:[#allocation10 + $0x80] sm:$0xff] }
 0x417   :  { %1176 = vadd.xlane.f32.xlu0 %v1114_v45  ;;  %v2747_v45 = vld [vmem:[#allocation10 + $0x28] sm:$0xff]  ;;  %v1246_v57 = vmax.f32 %v1214_v29, %v1218_v12  ;;  %vm1196_vm0 = vcmp.gt.f32.partialorder %v2800_v42, 0.0 }
 0x418   :  { %vm1185_vm5 = vcmp.gt.f32.partialorder %v2747_v45, 0.0 }
 0x419   :  { %v1217_v19 = vsel %vm1185_vm5, %v2701_v47, -1e+30  ;;  %vm1201_vm5 = vcmp.gt.f32.partialorder %v2821_v55, 0.0 }
 0x41a   :  { %v1026_v63 = vpop.f32.mrf.mxu0  ;;  %v2723_v6 = vpop.xlane.xlu1 %1148  ;;  %v1245_v48 = vmax.f32 %v1213_v14, %v1217_v19  ;;  %v2819_v19 = vld [vmem:[#allocation10 + $0xa0] sm:$0xff] }
 0x41b   :  { %v2687_v3 = vadd.f32 %v1026_v63, %v938_v13  ;;  %3177 = vst [vmem:[#allocation66_spill] sm:$0xff] %v2723_v6  ;;  %v2756_v63 = vld [vmem:[#allocation10 + $0x38] sm:$0xff]  ;;  %v1228_v21 = vsel %vm1196_vm0, %v2723_v6, -1e+30  ;;  %vm1200_vm4 = vcmp.gt.f32.partialorder %v2819_v19, 0.0 }
 0x41c   :  { %vm1187_vm7 = vcmp.gt.f32.partialorder %v2756_v63, 0.0 }
 0x41d   :  { %3161 = vst [vmem:[#allocation50_spill] sm:$0xff] %v2687_v3  ;;  %v1115_v35 = vmul.f32 %v2521_v51, %v2687_v3  ;;  %v2709_v51 = vpop.xlane.xlu0 %1134  ;;  %v1219_v9 = vsel %vm1187_vm7, %v2705_v37, -1e+30  ;;  %v1222_v37 = vsel %vm1190_vm10, %v2711_v18, -1e+30  ;;  %v2839_v18 = vld [vmem:[#allocation10 + $0xc8] sm:$0xff] }
 0x41e   :  { %3171 = vst [vmem:[#allocation60_spill] sm:$0xff] %v2709_v51  ;;  %v1221_v47 = vsel %vm1189_vm9, %v2709_v51, -1e+30  ;;  %v1247_v46 = vmax.f32 %v1215_v1, %v1219_v9  ;;  %v2813_v51 = vld [vmem:[#allocation10 + $0x98] sm:$0xff]  ;;  %v1250_v29 = vmax.f32 %v1246_v57, %v1222_v37  ;;  %v1226_v9 = vsel %vm1194_vm14, %v2719_v15, -1e+30 }
 0x41f   :  { %1178 = vadd.xlane.f32.xlu1 %v1115_v35  ;;  %v2758_v35 = vld [vmem:[#allocation10 + $0x40] sm:$0xff]  ;;  %v1249_v14 = vmax.f32 %v1245_v48, %v1221_v47  ;;  %vm1199_vm3 = vcmp.gt.f32.partialorder %v2813_v51, 0.0  ;;  %v2835_v37 = vld [vmem:[#allocation10 + $0xb8] sm:$0xff]  ;;  %vm1205_vm9 = vcmp.gt.f32.partialorder %v2839_v18, 0.0 }
 0x420   :  { %vm1188_vm8 = vcmp.gt.f32.partialorder %v2758_v35, 0.0  ;;  %v2837_v57 = vld [vmem:[#allocation10 + $0xc0] sm:$0xff]  ;;  %vm1203_vm7 = vcmp.gt.f32.partialorder %v2835_v37, 0.0 }
 0x421   :  { %v1220_v10 = vsel %vm1188_vm8, %v2707_v5, -1e+30  ;;  %v1225_v5 = vsel %vm1193_vm13, %v2717_v4, -1e+30  ;;  %vm1204_vm8 = vcmp.gt.f32.partialorder %v2837_v57, 0.0 }
 0x422   :  { %v2725_v26 = vpop.xlane.xlu2 %1150  ;;  %v1248_v60 = vmax.f32 %v1244_v56, %v1220_v10  ;;  %v2830_v10 = vld [vmem:[#allocation10 + $0xb0] sm:$0xff]  ;;  %v1251_v56 = vmax.f32 %v1247_v46, %v1223_v8  ;;  %v1253_v47 = vmax.f32 %v1249_v14, %v1225_v5  ;;  %v2855_v46 = vld [vmem:[#allocation10 + $0xd8] sm:$0xff]  ;;  %v1060_v14 = vld [vmem:[#allocation10 + $0xe8] sm:$0xff] }
 0x423   :  { %3178 = vst [vmem:[#allocation67_spill] sm:$0xff] %v2725_v26  ;;  %v1229_v23 = vsel %vm1197_vm1, %v2725_v26, -1e+30  ;;  %vm1202_vm6 = vcmp.gt.f32.partialorder %v2830_v10, 0.0  ;;  %v2853_v5 = vld [vmem:[#allocation10 + $0xd0] sm:$0xff]  ;;  %vm1207_vm11 = vcmp.gt.f32.partialorder %v2855_v46, 0.0 }
 0x424   :  { %vm1206_vm10 = vcmp.gt.f32.partialorder %v2853_v5, 0.0 }
 0x425   :  { %v2715_v32 = vpop.xlane.xlu0 %1140 }
 0x426   :  { %3174 = vst [vmem:[#allocation63_spill] sm:$0xff] %v2715_v32  ;;  %v1224_v50 = vsel %vm1192_vm12, %v2715_v32, -1e+30  ;;  %vm1209_vm12 = vcmp.gt.f32.partialorder %v1060_v14, 0.0 }
 0x427   :  { %v1252_v12 = vmax.f32 %v1248_v60, %v1224_v50  ;;  %v1254_v60 = vmax.f32 %v1250_v29, %v1226_v9 }
 0x429   :  { %v1256_v9 = vmax.f32 %v1252_v12, %v1228_v21 }
 0x42d   :  { %v2721_v31 = vpop.xlane.xlu0 %1146 }
 0x42e   :  { %v1227_v1 = vsel %vm1195_vm15, %v2721_v31, -1e+30 }
 0x42f   :  { %v1255_v8 = vmax.f32 %v1251_v56, %v1227_v1  ;;  %v1257_v1 = vmax.f32 %v1253_v47, %v1229_v23 }
 0x432   :  { %v2729_v7 = vpop.xlane.xlu1 %1154 }
 0x433   :  { %3180 = vst [vmem:[#allocation69_spill] sm:$0xff] %v2729_v7  ;;  %v1231_v6 = vsel %vm1199_vm3, %v2729_v7, -1e+30  ;;  %v1061_v7 = vld [vmem:[#allocation10 + $0xf0] sm:$0xff] }
 0x434   :  { %v1259_v21 = vmax.f32 %v1255_v8, %v1231_v6  ;;  %vm1210_vm14 = vcmp.gt.f32.partialorder %v1061_v7, 0.0 }
 0x435   :  { %v2727_v43 = vpop.xlane.xlu0 %1152 }
 0x436   :  { %3179 = vst [vmem:[#allocation68_spill] sm:$0xff] %v2727_v43  ;;  %v1230_v50 = vsel %vm1198_vm2, %v2727_v43, -1e+30  ;;  %v1059_v43 = vld [vmem:[#allocation10 + $0xe0] sm:$0xff] }
 0x437   :  { %v1258_v23 = vmax.f32 %v1254_v60, %v1230_v50  ;;  %vm1208_vm13 = vcmp.gt.f32.partialorder %v1059_v43, 0.0 }
 0x43a   :  { %v2731_v2 = vpop.xlane.xlu2 %1156 }
 0x43b   :  { %3181 = vst [vmem:[#allocation70_spill] sm:$0xff] %v2731_v2  ;;  %v1232_v56 = vsel %vm1200_vm4, %v2731_v2, -1e+30  ;;  %v1062_v2 = vld [vmem:[#allocation10 + $0xf8] sm:$0xff] }
 0x43c   :  { %v1260_v60 = vmax.f32 %v1256_v9, %v1232_v56  ;;  %vm1211_vm15 = vcmp.gt.f32.partialorder %v1062_v2, 0.0 }
 0x442   :  { %v2737_v36 = vpop.xlane.xlu0 %1158 }
 0x443   :  { %3182 = vst [vmem:[#allocation71_spill] sm:$0xff] %v2737_v36  ;;  %v1233_v26 = vsel %vm1201_vm5, %v2737_v36, -1e+30 }
 0x444   :  { %v1261_v36 = vmax.f32 %v1257_v1, %v1233_v26 }
 0x44a   :  { %v2752_v13 = vpop.xlane.xlu1 %1160 }
 0x44b   :  { %3183 = vst [vmem:[#allocation72_spill] sm:$0xff] %v2752_v13  ;;  %v1234_v38 = vsel %vm1202_vm6, %v2752_v13, -1e+30 }
 0x452   :  { %v2765_v61 = vpop.xlane.xlu2 %1162 }
 0x453   :  { %3184 = vst [vmem:[#allocation73_spill] sm:$0xff] %v2765_v61  ;;  %v1235_v12 = vsel %vm1203_vm7, %v2765_v61, -1e+30  ;;  %v1262_v61 = vmax.f32 %v1258_v23, %v1234_v38 }
 0x454   :  { %v1263_v53 = vmax.f32 %v1259_v21, %v1235_v12 }
 0x45a   :  { %v2780_v28 = vpop.xlane.xlu0 %1164 }
 0x45b   :  { %3185 = vst [vmem:[#allocation74_spill] sm:$0xff] %v2780_v28  ;;  %v1236_v13 = vsel %vm1204_vm8, %v2780_v28, -1e+30 }
 0x45c   :  { %v1264_v28 = vmax.f32 %v1260_v60, %v1236_v13 }
 0x462   :  { %v2804_v20 = vpop.xlane.xlu1 %1166 }
 0x463   :  { %3186 = vst [vmem:[#allocation75_spill] sm:$0xff] %v2804_v20  ;;  %v1237_v47 = vsel %vm1205_vm9, %v2804_v20, -1e+30 }
 0x464   :  { %v1265_v20 = vmax.f32 %v1261_v36, %v1237_v47 }
 0x46a   :  { %v2815_v33 = vpop.xlane.xlu2 %1168 }
 0x46b   :  { %3187 = vst [vmem:[#allocation76_spill] sm:$0xff] %v2815_v33  ;;  %v1238_v6 = vsel %vm1206_vm10, %v2815_v33, -1e+30 }
 0x46c   :  { %v1266_v25 = vmax.f32 %v1262_v61, %v1238_v6 }
 0x472   :  { %v2832_v48 = vpop.xlane.xlu0 %1170 }
 0x473   :  { %3188 = vst [vmem:[#allocation77_spill] sm:$0xff] %v2832_v48  ;;  %v1239_v8 = vsel %vm1207_vm11, %v2832_v48, -1e+30 }
 0x474   :  { %v1267_v62 = vmax.f32 %v1263_v53, %v1239_v8 }
 0x47a   :  { %v2861_v29 = vpop.xlane.xlu1 %1172 }
 0x47b   :  { %v1240_v26 = vsel %vm1208_vm13, %v2861_v29, -1e+30 }
 0x47c   :  { %v1268_v56 = vmax.f32 %v1264_v28, %v1240_v26 }
 0x482   :  { %v2872_v49 = vpop.xlane.xlu2 %1174 }
 0x483   :  { %v1241_v50 = vsel %vm1209_vm12, %v2872_v49, -1e+30 }
 0x484   :  { %v1269_v4 = vmax.f32 %v1265_v20, %v1241_v50  ;;  %v3190_v50 = vld [vmem:[#allocation50_spill] sm:$0xff] }
 0x486   :  { %v1272_v39 = vmax.f32 %v1268_v56, %v1269_v4 }
 0x48a   :  { %v2883_v32 = vpop.xlane.xlu0 %1176 }
 0x48b   :  { %v1242_v1 = vsel %vm1210_vm14, %v2883_v32, -1e+30 }
 0x48c   :  { %v1270_v33 = vmax.f32 %v1266_v25, %v1242_v1 }
 0x492   :  { %v2890_v16 = vpop.xlane.xlu1 %1178 }
 0x493   :  { %v1243_v9 = vsel %vm1211_vm15, %v2890_v16, -1e+30 }
 0x494   :  { %v1271_v48 = vmax.f32 %v1267_v62, %v1243_v9 }
 0x496   :  { %v1273_v38 = vmax.f32 %v1270_v33, %v1271_v48 }
 0x498   :  { %v1274_v23 = vmax.f32 %v1272_v39, %v1273_v38 }
 0x49a   :  { %v1275_v36 = vrot.slane %v1274_v23, 4 }
 0x49c   :  { %v1276_v21 = vmax.f32 %v1274_v23, %v1275_v36 }
 0x49e   :  { %v1277_v12 = vrot.slane %v1276_v21, 2 }
 0x4a0   :  { %v1278_v47 = vmax.f32 %v1276_v21, %v1277_v12  ;;  %v3191_v21 = vld [vmem:[#allocation49_spill] sm:$0xff]  ;;  %v3192_v12 = vld [vmem:[#allocation48_spill] sm:$0xff] }
 0x4a2   :  { %v1279_v3 = vrot.slane %v1278_v47, 1 }
 0x4a4   :  { %v1280_v15 = vmax.f32 %v1278_v47, %v1279_v3 }
 0x4a6   :  { %v1312_v13 = vmul.f32 %v1280_v15, %v1062_v2  ;;  %v1311_v61 = vmul.f32 %v1280_v15, %v1061_v7  ;;  %v1310_v53 = vmul.f32 %v1280_v15, %v1060_v14  ;;  %v1309_v20 = vmul.f32 %v1280_v15, %v1059_v43 }
 0x4a7   :  { %v1296_v28 = vmul.f32 %v1280_v15, %v2792_v52  ;;  %v1295_v25 = vmul.f32 %v1280_v15, %v2787_v24  ;;  %v1308_v33 = vmul.f32 %v1280_v15, %v2855_v46  ;;  %v1294_v62 = vmul.f32 %v1280_v15, %v2778_v58 }
 0x4a8   :  { %1375 = vadd.xlane.f32.xlu2 %v1312_v13  ;;  %1373 = vadd.xlane.f32.xlu0 %v1311_v61  ;;  %v1307_v39 = vmul.f32 %v1280_v15, %v2853_v5  ;;  %v1306_v3 = vmul.f32 %v1280_v15, %v2839_v18  ;;  %v1293_v4 = vmul.f32 %v1280_v15, %v2776_v41  ;;  %v1473_v5 = vlaneseq }
 0x4a9   :  { %1371 = vadd.xlane.f32.xlu1 %v1310_v53  ;;  %v1292_v52 = vmul.f32 %v1280_v15, %v2771_v44  ;;  %v1305_v24 = vmul.f32 %v1280_v15, %v2837_v57  ;;  %v1291_v43 = vmul.f32 %v1280_v15, %v2769_v59  ;;  %v1304_v58 = vmul.f32 %v1280_v15, %v2835_v37 }
 0x4aa   :  { %v1303_v7 = vmul.f32 %v1280_v15, %v2830_v10  ;;  %v1290_v18 = vmul.f32 %v1280_v15, %v2763_v11  ;;  %v1289_v41 = vmul.f32 %v1280_v15, %v2758_v35  ;;  %v1302_v44 = vmul.f32 %v1280_v15, %v2821_v55 }
 0x4ab   :  { %v1288_v2 = vmul.f32 %v1280_v15, %v2756_v63  ;;  %v1301_v59 = vmul.f32 %v1280_v15, %v2819_v19  ;;  %v1300_v48 = vmul.f32 %v1280_v15, %v2813_v51  ;;  %v1287_v10 = vmul.f32 %v1280_v15, %v2750_v54 }
 0x4ac   :  { %v1286_v11 = vmul.f32 %v1280_v15, %v2747_v45  ;;  %v1299_v35 = vmul.f32 %v1280_v15, %v2809_v0  ;;  %v1285_v55 = vmul.f32 %v1280_v15, %v2743_v27  ;;  %v1298_v63 = vmul.f32 %v1280_v15, %v2802_v40 }
 0x4ad   :  { %v1297_v19 = vmul.f32 %v1280_v15, %v2800_v42  ;;  %v1284_v51 = vmul.f32 %v1280_v15, %v2741_v17  ;;  %v1283_v54 = vmul.f32 %v1280_v15, %v2739_v34  ;;  %v1282_v45 = vmul.f32 %v1280_v15, %v2735_v30 }
 0x4ae   :  { %v1281_v0 = vmul.f32 %v1280_v15, %v2733_v22  ;;  %v2924_v60 = vand.u32 127, %v1473_v5 }
 0x4b0   :  { %1369 = vadd.xlane.f32.xlu0 %v1309_v20  ;;  %1343 = vadd.xlane.f32.xlu2 %v1296_v28  ;;  %vm1475_vm0 = vcmp.eq.s32.totalorder %v2924_v60, 32  ;;  %v3193_v20 = vld [vmem:[#allocation77_spill] sm:$0xff]  ;;  %v1073_v60 = vld [vmem:[#allocation11 + $0x48] sm:$0xff] }
 0x4b1   :  { %1341 = vadd.xlane.f32.xlu1 %v1295_v25  ;;  %v1507_v26 = vsel %vm1475_vm0, 1.0, %v3190_v50  ;;  %v1505_v47 = vsel %vm1475_vm0, 1.0, %v3192_v12 }
 0x4b8   :  { %1367 = vadd.xlane.f32.xlu2 %v1308_v33  ;;  %1339 = vadd.xlane.f32.xlu0 %v1294_v62  ;;  %v3194_v33 = vld [vmem:[#allocation64_spill] sm:$0xff] }
 0x4b9   :  { %1365 = vadd.xlane.f32.xlu1 %v1307_v39  ;;  %v3195_v39 = vld [vmem:[#allocation76_spill] sm:$0xff] }
 0x4c0   :  { %1363 = vadd.xlane.f32.xlu0 %v1306_v3  ;;  %1337 = vadd.xlane.f32.xlu2 %v1293_v4 }
 0x4c1   :  { %1335 = vadd.xlane.f32.xlu1 %v1292_v52  ;;  %v3196_v52 = vld [vmem:[#allocation47_spill] sm:$0xff] }
 0x4c8   :  { %1361 = vadd.xlane.f32.xlu2 %v1305_v24  ;;  %1333 = vadd.xlane.f32.xlu0 %v1291_v43  ;;  %v1504_v24 = vsel %vm1475_vm0, 1.0, %v3196_v52 }
 0x4c9   :  { %1359 = vadd.xlane.f32.xlu1 %v1304_v58 }
 0x4d0   :  { %1357 = vadd.xlane.f32.xlu0 %v1303_v7  ;;  %1331 = vadd.xlane.f32.xlu2 %v1290_v18  ;;  %v3197_v18 = vld [vmem:[#allocation34_spill] sm:$0xff] }
 0x4d1   :  { %1329 = vadd.xlane.f32.xlu1 %v1289_v41  ;;  %v1491_v41 = vsel %vm1475_vm0, 1.0, %v3197_v18 }
 0x4d8   :  { %1355 = vadd.xlane.f32.xlu2 %v1302_v44  ;;  %1327 = vadd.xlane.f32.xlu0 %v1288_v2 }
 0x4d9   :  { %1353 = vadd.xlane.f32.xlu1 %v1301_v59 }
 0x4e0   :  { %1351 = vadd.xlane.f32.xlu0 %v1300_v48  ;;  %1325 = vadd.xlane.f32.xlu2 %v1287_v10  ;;  %v3198_v10 = vld [vmem:[#allocation33_spill] sm:$0xff] }
 0x4e1   :  { %1323 = vadd.xlane.f32.xlu1 %v1286_v11  ;;  %v1490_v11 = vsel %vm1475_vm0, 1.0, %v3198_v10 }
 0x4e8   :  { %1349 = vadd.xlane.f32.xlu2 %v1299_v35  ;;  %1321 = vadd.xlane.f32.xlu0 %v1285_v55 }
 0x4e9   :  { %1347 = vadd.xlane.f32.xlu1 %v1298_v63 }
 0x4f0   :  { %1345 = vadd.xlane.f32.xlu0 %v1297_v19  ;;  %1319 = vadd.xlane.f32.xlu2 %v1284_v51  ;;  %v3199_v19 = vld [vmem:[#allocation75_spill] sm:$0xff] }
 0x4f1   :  { %1317 = vadd.xlane.f32.xlu1 %v1283_v54  ;;  %v3200_v54 = vld [vmem:[#allocation63_spill] sm:$0xff] }
 0x4f8   :  { %1315 = vadd.xlane.f32.xlu2 %v1282_v45  ;;  %1313 = vadd.xlane.f32.xlu0 %v1281_v0 }
 0x51b   :  { %v1376_v27 = vpop.xlane.xlu2 %1375  ;;  %v1374_v40 = vpop.xlane.xlu0 %1373 }
 0x51c   :  { %v1408_v37 = vsub.f32 %v2890_v16, %v1376_v27  ;;  %v1407_v57 = vsub.f32 %v2883_v32, %v1374_v40  ;;  %v1372_v42 = vpop.xlane.xlu1 %1371  ;;  %v3189_v32 = vld [vmem:[#allocation65_spill] sm:$0xff]  ;;  %v3201_v27 = vld [vmem:[#allocation62_spill] sm:$0xff] }
 0x51d   :  { %v1406_v17 = vsub.f32 %v2872_v49, %v1372_v42 }
 0x51e   :  { %v1471_v34 = vmul.f32 1.442695, %v1408_v37  ;;  %v1469_v46 = vmul.f32 1.442695, %v1407_v57  ;;  %v3202_v57 = vld [vmem:[#allocation46_spill] sm:$0xff] }
 0x51f   :  { %v1467_v14 = vmul.f32 1.442695, %v1406_v17  ;;  %v1503_v42 = vsel %vm1475_vm0, 1.0, %v3202_v57 }
 0x520   :  { %1967 = vpow2.f32 %v1471_v34 }
 0x521   :  { %1969 = vpow2.f32 %v1469_v46 }
 0x522   :  { %1971 = vpow2.f32 %v1467_v14 }
 0x523   :  { %v1370_v15 = vpop.xlane.xlu0 %1369  ;;  %v1344_v22 = vpop.xlane.xlu2 %1343 }
 0x524   :  { %v1405_v30 = vsub.f32 %v2861_v29, %v1370_v15  ;;  %v1392_v16 = vsub.f32 %v2721_v31, %v1344_v22  ;;  %v1342_v6 = vpop.xlane.xlu1 %1341  ;;  %v1506_v31 = vsel %vm1475_vm0, 1.0, %v3191_v21  ;;  %v3203_v22 = vld [vmem:[#allocation32_spill] sm:$0xff] }
 0x525   :  { %v1391_v8 = vsub.f32 %v3189_v32, %v1342_v6 }
 0x526   :  { %v1968_v49 = vpop.eup %1967  ;;  %v1465_v1 = vmul.f32 1.442695, %v1405_v30  ;;  %v1439_v9 = vmul.f32 1.442695, %v1392_v16  ;;  %v1489_v30 = vsel %vm1475_vm0, 1.0, %v3203_v22  ;;  %v3204_v16 = vld [vmem:[#allocation45_spill] sm:$0xff] }
 0x527   :  { %v1970_v56 = vpop.eup %1969  ;;  %v1437_v38 = vmul.f32 1.442695, %v1391_v8  ;;  %v1539_v23 = vmul.f32 %v1968_v49, %v1507_v26  ;;  %v1502_v6 = vsel %vm1475_vm0, 1.0, %v3204_v16  ;;  %v3205_v26 = vld [vmem:[#allocation74_spill] sm:$0xff] }
 0x528   :  { %v1972_v36 = vpop.eup %1971  ;;  %1973 = vpow2.f32 %v1465_v1  ;;  %v1538_v29 = vmul.f32 %v1970_v56, %v1506_v31  ;;  %v3206_v56 = vld [vmem:[#allocation61_spill] sm:$0xff]  ;;  %v3208_v31 = vld [vmem:[#allocation44_spill] sm:$0xff] }
 0x529   :  { %1975 = vpow2.f32 %v1439_v9  ;;  %1560 = vmatpush.msra.mxu2 %v1539_v23  ;;  %v1537_v53 = vmul.f32 %v1972_v36, %v1505_v47  ;;  %v3207_v23 = vld [vmem:[#allocation73_spill] sm:$0xff] }
 0x52a   :  { %1977 = vpow2.f32 %v1437_v38 }
 0x52b   :  { %1561 = vmatpush.msra.mxu2 %v1538_v29  ;;  %v1368_v13 = vpop.xlane.xlu2 %1367  ;;  %v1340_v61 = vpop.xlane.xlu0 %1339  ;;  %v1501_v29 = vsel %vm1475_vm0, 1.0, %v3208_v31 }
 0x52c   :  { %v1404_v28 = vsub.f32 %v3193_v20, %v1368_v13  ;;  %v1366_v25 = vpop.xlane.xlu1 %1365  ;;  %v1390_v62 = vsub.f32 %v3194_v33, %v1340_v61  ;;  %v3209_v61 = vld [vmem:[#allocation31_spill] sm:$0xff] }
 0x52d   :  { %v1403_v3 = vsub.f32 %v3195_v39, %v1366_v25  ;;  %1562 = vmatpush.msra.mxu2 %v1537_v53  ;;  %v1488_v53 = vsel %vm1475_vm0, 1.0, %v3209_v61 }
 0x52e   :  { %v1974_v4 = vpop.eup %1973  ;;  %v1463_v43 = vmul.f32 1.442695, %v1404_v28  ;;  %v1435_v58 = vmul.f32 1.442695, %v1390_v62  ;;  %v3210_v62 = vld [vmem:[#allocation30_spill] sm:$0xff] }
 0x52f   :  { %v1976_v7 = vpop.eup %1975  ;;  %v1461_v44 = vmul.f32 1.442695, %v1403_v3  ;;  %v1536_v2 = vmul.f32 %v1974_v4, %v1504_v24  ;;  %v1487_v39 = vsel %vm1475_vm0, 1.0, %v3210_v62  ;;  %v3211_v24 = vld [vmem:[#allocation72_spill] sm:$0xff] }
 0x530   :  { %v1978_v59 = vpop.eup %1977  ;;  %1979 = vpow2.f32 %v1463_v43  ;;  %v1523_v48 = vmul.f32 %v1976_v7, %v1491_v41  ;;  %v3213_v41 = vld [vmem:[#allocation59_spill] sm:$0xff] }
 0x531   :  { %1981 = vpow2.f32 %v1461_v44  ;;  %1563 = vmatpush.msra.mxu2 %v1536_v2  ;;  %v1522_v35 = vmul.f32 %v1978_v59, %v1490_v11  ;;  %v3214_v59 = vld [vmem:[#allocation43_spill] sm:$0xff] }
 0x532   :  { %1983 = vpow2.f32 %v1435_v58  ;;  %1540 = vmatpush.msra.mxu1 %v1523_v48  ;;  %v3212_v58 = vld [vmem:[#allocation60_spill] sm:$0xff]  ;;  %v1500_v48 = vsel %vm1475_vm0, 1.0, %v3214_v59 }
 0x533   :  { %v1364_v55 = vpop.xlane.xlu0 %1363  ;;  %v1338_v63 = vpop.xlane.xlu2 %1337 }
 0x534   :  { %1541 = vmatpush.msra.mxu1 %v1522_v35  ;;  %v1402_v51 = vsub.f32 %v3199_v19, %v1364_v55  ;;  %v1389_v45 = vsub.f32 %v3200_v54, %v1338_v63  ;;  %v1336_v0 = vpop.xlane.xlu1 %1335 }
 0x535   :  { %v1388_v40 = vsub.f32 %v3201_v27, %v1336_v0 }
 0x536   :  { %v1980_v37 = vpop.eup %1979  ;;  %v1459_v5 = vmul.f32 1.442695, %v1402_v51  ;;  %v1433_v17 = vmul.f32 1.442695, %v1389_v45  ;;  %v3215_v51 = vld [vmem:[#allocation29_spill] sm:$0xff]  ;;  %v3216_v45 = vld [vmem:[#allocation42_spill] sm:$0xff] }
 0x537   :  { %v1982_v34 = vpop.eup %1981  ;;  %v1431_v46 = vmul.f32 1.442695, %v1388_v40  ;;  %v1535_v14 = vmul.f32 %v1980_v37, %v1503_v42  ;;  %v1486_v54 = vsel %vm1475_vm0, 1.0, %v3215_v51  ;;  %v1499_v0 = vsel %vm1475_vm0, 1.0, %v3216_v45  ;;  %v3217_v42 = vld [vmem:[#allocation71_spill] sm:$0xff] }
 0x538   :  { %v1984_v15 = vpop.eup %1983  ;;  %1985 = vpow2.f32 %v1459_v5  ;;  %v1534_v8 = vmul.f32 %v1982_v34, %v1502_v6  ;;  %v3218_v34 = vld [vmem:[#allocation58_spill] sm:$0xff] }
 0x539   :  { %1987 = vpow2.f32 %v1433_v17  ;;  %v1521_v32 = vmul.f32 %v1984_v15, %v1489_v30  ;;  %1564 = vmatpush.msra.mxu2 %v1535_v14  ;;  %v3219_v14 = vld [vmem:[#allocation70_spill] sm:$0xff]  ;;  %v3220_v30 = vld [vmem:[#allocation41_spill] sm:$0xff] }
 0x53a   :  { %1989 = vpow2.f32 %v1431_v46  ;;  %v1498_v16 = vsel %vm1475_vm0, 1.0, %v3220_v30 }
 0x53b   :  { %1542 = vmatpush.msra.mxu1 %v1521_v32  ;;  %1565 = vmatpush.msra.mxu2 %v1534_v8  ;;  %v1362_v49 = vpop.xlane.xlu2 %1361  ;;  %v1334_v50 = vpop.xlane.xlu0 %1333 }
 0x53c   :  { %v1401_v1 = vsub.f32 %v3205_v26, %v1362_v49  ;;  %v1360_v9 = vpop.xlane.xlu1 %1359  ;;  %v1387_v38 = vsub.f32 %v3206_v56, %v1334_v50  ;;  %v3221_v49 = vld [vmem:[#allocation28_spill] sm:$0xff] }
 0x53d   :  { %v1400_v36 = vsub.f32 %v3207_v23, %v1360_v9  ;;  %v1485_v50 = vsel %vm1475_vm0, 1.0, %v3221_v49 }
 0x53e   :  { %v1986_v21 = vpop.eup %1985  ;;  %v1457_v12 = vmul.f32 1.442695, %v1401_v1  ;;  %v1429_v47 = vmul.f32 1.442695, %v1387_v38  ;;  %v3222_v38 = vld [vmem:[#allocation27_spill] sm:$0xff] }
 0x53f   :  { %v1988_v13 = vpop.eup %1987  ;;  %v1455_v20 = vmul.f32 1.442695, %v1400_v36  ;;  %v1533_v28 = vmul.f32 %v1986_v21, %v1501_v29  ;;  %v1484_v23 = vsel %vm1475_vm0, 1.0, %v3222_v38  ;;  %v3223_v29 = vld [vmem:[#allocation69_spill] sm:$0xff] }
 0x540   :  { %v1990_v25 = vpop.eup %1989  ;;  %1991 = vpow2.f32 %v1457_v12  ;;  %v1520_v33 = vmul.f32 %v1988_v13, %v1488_v53  ;;  %v3225_v53 = vld [vmem:[#allocation56_spill] sm:$0xff] }
 0x541   :  { %1993 = vpow2.f32 %v1455_v20  ;;  %1566 = vmatpush.msra.mxu2 %v1533_v28  ;;  %v1519_v3 = vmul.f32 %v1990_v25, %v1487_v39  ;;  %v3226_v25 = vld [vmem:[#allocation40_spill] sm:$0xff] }
 0x542   :  { %1995 = vpow2.f32 %v1429_v47  ;;  %1543 = vmatpush.msra.mxu1 %v1520_v33  ;;  %v3224_v47 = vld [vmem:[#allocation57_spill] sm:$0xff]  ;;  %v1497_v33 = vsel %vm1475_vm0, 1.0, %v3226_v25 }
 0x543   :  { %v1358_v4 = vpop.xlane.xlu0 %1357  ;;  %v1332_v52 = vpop.xlane.xlu2 %1331 }
 0x544   :  { %1544 = vmatpush.msra.mxu1 %v1519_v3  ;;  %v1399_v43 = vsub.f32 %v3211_v24, %v1358_v4  ;;  %v1386_v7 = vsub.f32 %v3212_v58, %v1332_v52  ;;  %v1330_v18 = vpop.xlane.xlu1 %1329 }
 0x545   :  { %v1385_v44 = vsub.f32 %v3213_v41, %v1330_v18 }
 0x546   :  { %v1992_v2 = vpop.eup %1991  ;;  %v1453_v10 = vmul.f32 1.442695, %v1399_v43  ;;  %v1427_v11 = vmul.f32 1.442695, %v1386_v7  ;;  %v3227_v43 = vld [vmem:[#allocation26_spill] sm:$0xff]  ;;  %v3228_v7 = vld [vmem:[#allocation39_spill] sm:$0xff] }
 0x547   :  { %v1994_v35 = vpop.eup %1993  ;;  %v1425_v55 = vmul.f32 1.442695, %v1385_v44  ;;  %v1532_v63 = vmul.f32 %v1992_v2, %v1500_v48  ;;  %v1483_v58 = vsel %vm1475_vm0, 1.0, %v3227_v43  ;;  %v1496_v18 = vsel %vm1475_vm0, 1.0, %v3228_v7  ;;  %v3229_v48 = vld [vmem:[#allocation68_spill] sm:$0xff] }
 0x548   :  { %v1996_v19 = vpop.eup %1995  ;;  %1997 = vpow2.f32 %v1453_v10  ;;  %v1531_v40 = vmul.f32 %v1994_v35, %v1499_v0  ;;  %v3230_v35 = vld [vmem:[#allocation53_spill] sm:$0xff] }
 0x549   :  { %1999 = vpow2.f32 %v1427_v11  ;;  %v1518_v27 = vmul.f32 %v1996_v19, %v1486_v54  ;;  %1567 = vmatpush.msra.mxu2 %v1532_v63  ;;  %v3231_v63 = vld [vmem:[#allocation67_spill] sm:$0xff]  ;;  %v3232_v54 = vld [vmem:[#allocation38_spill] sm:$0xff] }
 0x54a   :  { %2001 = vpow2.f32 %v1425_v55  ;;  %v1495_v45 = vsel %vm1475_vm0, 1.0, %v3232_v54 }
 0x54b   :  { %1545 = vmatpush.msra.mxu1 %v1518_v27  ;;  %1568 = vmatpush.msra.mxu2 %v1531_v40  ;;  %v1356_v37 = vpop.xlane.xlu2 %1355  ;;  %v1328_v57 = vpop.xlane.xlu0 %1327 }
 0x54c   :  { %v1398_v5 = vsub.f32 %v3217_v42, %v1356_v37  ;;  %v1354_v17 = vpop.xlane.xlu1 %1353  ;;  %v1384_v46 = vsub.f32 %v3218_v34, %v1328_v57  ;;  %v3233_v37 = vld [vmem:[#allocation25_spill] sm:$0xff] }
 0x54d   :  { %v1397_v15 = vsub.f32 %v3219_v14, %v1354_v17  ;;  %v1482_v57 = vsel %vm1475_vm0, 1.0, %v3233_v37  ;;  %v2221_v37 = vmov 32  }
 0x54e   :  { %v1998_v22 = vpop.eup %1997  ;;  %v1451_v6 = vmul.f32 1.442695, %v1398_v5  ;;  %v1423_v32 = vmul.f32 1.442695, %v1384_v46  ;;  %v3234_v46 = vld [vmem:[#allocation24_spill] sm:$0xff]  ;;  %1961 = vset.pattern.permute.xlu1 %v2221_v37  ;;  %1962 = vset.pattern.permute.xlu0 %v2221_v37 }
 0x54f   :  { %v2000_v8 = vpop.eup %1999  ;;  %v1449_v26 = vmul.f32 1.442695, %v1397_v15  ;;  %v1530_v1 = vmul.f32 %v1998_v22, %v1498_v16  ;;  %v1481_v14 = vsel %vm1475_vm0, 1.0, %v3234_v46  ;;  %v3235_v16 = vld [vmem:[#allocation66_spill] sm:$0xff]  ;;  %v1074_v46 = vld [vmem:[#allocation11 + $0x50] sm:$0xff] }
 0x550   :  { %v2002_v9 = vpop.eup %2001  ;;  %2003 = vpow2.f32 %v1451_v6  ;;  %v1517_v56 = vmul.f32 %v2000_v8, %v1485_v50  ;;  %v3237_v50 = vld [vmem:[#allocation52_spill] sm:$0xff] }
 0x551   :  { %2005 = vpow2.f32 %v1449_v26  ;;  %1569 = vmatpush.msra.mxu2 %v1530_v1  ;;  %v1516_v36 = vmul.f32 %v2002_v9, %v1484_v23  ;;  %v3238_v9 = vld [vmem:[#allocation37_spill] sm:$0xff] }
 0x552   :  { %2007 = vpow2.f32 %v1423_v32  ;;  %1546 = vmatpush.msra.mxu1 %v1517_v56  ;;  %v3236_v32 = vld [vmem:[#allocation55_spill] sm:$0xff]  ;;  %v1494_v56 = vsel %vm1475_vm0, 1.0, %v3238_v9  ;;  %v1064_v9 = vld [vmem:[#allocation11] sm:$0xff] }
 0x553   :  { %v1352_v21 = vpop.xlane.xlu0 %1351  ;;  %v1326_v31 = vpop.xlane.xlu2 %1325 }
 0x554   :  { %1547 = vmatpush.msra.mxu1 %v1516_v36  ;;  %v1396_v12 = vsub.f32 %v3223_v29, %v1352_v21  ;;  %v1383_v13 = vsub.f32 %v3224_v47, %v1326_v31  ;;  %v1324_v61 = vpop.xlane.xlu1 %1323 }
 0x555   :  { %v1382_v20 = vsub.f32 %v3225_v53, %v1324_v61 }
 0x556   :  { %v2004_v28 = vpop.eup %2003  ;;  %v1447_v62 = vmul.f32 1.442695, %v1396_v12  ;;  %v1421_v39 = vmul.f32 1.442695, %v1383_v13  ;;  %v3239_v12 = vld [vmem:[#allocation23_spill] sm:$0xff]  ;;  %v3240_v13 = vld [vmem:[#allocation36_spill] sm:$0xff] }
 0x557   :  { %v2006_v3 = vpop.eup %2005  ;;  %v1419_v4 = vmul.f32 1.442695, %v1382_v20  ;;  %v1529_v52 = vmul.f32 %v2004_v28, %v1497_v33  ;;  %v1480_v47 = vsel %vm1475_vm0, 1.0, %v3239_v12  ;;  %v1493_v61 = vsel %vm1475_vm0, 1.0, %v3240_v13  ;;  %v3241_v33 = vld [vmem:[#allocation54_spill] sm:$0xff] }
 0x558   :  { %v2008_v24 = vpop.eup %2007  ;;  %2009 = vpow2.f32 %v1447_v62  ;;  %v1528_v44 = vmul.f32 %v2006_v3, %v1496_v18  ;;  %v3244_v18 = vld [vmem:[#allocation22_spill] sm:$0xff] }
 0x559   :  { %2011 = vpow2.f32 %v1421_v39  ;;  %v1515_v41 = vmul.f32 %v2008_v24, %v1483_v58  ;;  %1570 = vmatpush.msra.mxu2 %v1529_v52  ;;  %v3242_v39 = vld [vmem:[#allocation51_spill] sm:$0xff] }
 0x55a   :  { %2013 = vpow2.f32 %v1419_v4  ;;  %v3243_v52 = vld [vmem:[#allocation35_spill] sm:$0xff] }
 0x55b   :  { %1548 = vmatpush.msra.mxu1 %v1515_v41  ;;  %1571 = vmatpush.msra.mxu2 %v1528_v44  ;;  %v1350_v2 = vpop.xlane.xlu2 %1349  ;;  %v1322_v59 = vpop.xlane.xlu0 %1321  ;;  %v1492_v24 = vsel %vm1475_vm0, 1.0, %v3243_v52  ;;  %v1479_v41 = vsel %vm1475_vm0, 1.0, %v3244_v18 }
 0x55c   :  { %v1395_v10 = vsub.f32 %v3229_v48, %v1350_v2  ;;  %v1348_v11 = vpop.xlane.xlu1 %1347  ;;  %v1381_v55 = vsub.f32 %v3230_v35, %v1322_v59  ;;  %v1030_v2 = vld [vmem:[#allocation8 + $0x8] sm:$0xff] }
 0x55d   :  { %v1394_v19 = vsub.f32 %v3231_v63, %v1348_v11  ;;  %v3246_v63 = vld [vmem:[#allocation20_spill] sm:$0xff] }
 0x55e   :  { %v2010_v51 = vpop.eup %2009  ;;  %v1445_v0 = vmul.f32 1.442695, %v1395_v10  ;;  %v1417_v27 = vmul.f32 1.442695, %v1381_v55  ;;  %v3245_v10 = vld [vmem:[#allocation21_spill] sm:$0xff] }
 0x55f   :  { %v2012_v40 = vpop.eup %2011  ;;  %v1443_v42 = vmul.f32 1.442695, %v1394_v19  ;;  %v1527_v5 = vmul.f32 %v2010_v51, %v1495_v45  ;;  %v1478_v11 = vsel %vm1475_vm0, 1.0, %v3245_v10  ;;  %v1477_v19 = vsel %vm1475_vm0, 1.0, %v3246_v63  ;;  %v3247_v45 = vld [vmem:[#allocation19_spill] sm:$0xff] }
 0x560   :  { %v2014_v17 = vpop.eup %2013  ;;  %2015 = vpow2.f32 %v1445_v0  ;;  %v1514_v34 = vmul.f32 %v2012_v40, %v1482_v57  ;;  %v1476_v0 = vsel %vm1475_vm0, 1.0, %v3247_v45  ;;  %v1029_v40 = vld [vmem:[#allocation8] sm:$0xff]  ;;  %v1079_v57 = vld [vmem:[#allocation11 + $0x78] sm:$0xff] }
 0x561   :  { %2017 = vpow2.f32 %v1443_v42  ;;  %1572 = vmatpush.msra.mxu2 %v1527_v5  ;;  %v1513_v15 = vmul.f32 %v2014_v17, %v1481_v14  ;;  %v1078_v42 = vld [vmem:[#allocation11 + $0x70] sm:$0xff]  ;;  %1604 = vmatpush.msra.mxu3 %v1079_v57  ;;  %v1077_v5 = vld [vmem:[#allocation11 + $0x68] sm:$0xff]  ;;  %v1076_v17 = vld [vmem:[#allocation11 + $0x60] sm:$0xff] }
 0x562   :  { %2019 = vpow2.f32 %v1417_v27  ;;  %1549 = vmatpush.msra.mxu1 %v1514_v34  ;;  %v1075_v34 = vld [vmem:[#allocation11 + $0x58] sm:$0xff] }
 0x563   :  { %v1346_v22 = vpop.xlane.xlu0 %1345  ;;  %v1320_v30 = vpop.xlane.xlu2 %1319  ;;  %1605 = vmatpush.msra.mxu3 %v1078_v42 }
 0x564   :  { %1550 = vmatpush.msra.mxu1 %v1513_v15  ;;  %v1393_v6 = vsub.f32 %v3235_v16, %v1346_v22  ;;  %v1380_v8 = vsub.f32 %v3236_v32, %v1320_v30  ;;  %v1318_v49 = vpop.xlane.xlu1 %1317  ;;  %v1072_v16 = vld [vmem:[#allocation11 + $0x40] sm:$0xff]  ;;  %v1070_v32 = vld [vmem:[#allocation11 + $0x30] sm:$0xff] }
 0x565   :  { %v1379_v26 = vsub.f32 %v3237_v50, %v1318_v49  ;;  %1606 = vmatpush.msra.mxu3 %v1077_v5  ;;  %v1068_v49 = vld [vmem:[#allocation11 + $0x20] sm:$0xff]  ;;  %v1067_v50 = vld [vmem:[#allocation11 + $0x18] sm:$0xff] }
 0x566   :  { %v2016_v1 = vpop.eup %2015  ;;  %v1441_v38 = vmul.f32 1.442695, %v1393_v6  ;;  %v1415_v23 = vmul.f32 1.442695, %v1380_v8  ;;  %v1071_v6 = vld [vmem:[#allocation11 + $0x38] sm:$0xff]  ;;  %v1069_v8 = vld [vmem:[#allocation11 + $0x28] sm:$0xff] }
 0x567   :  { %v2018_v36 = vpop.eup %2017  ;;  %v1413_v21 = vmul.f32 1.442695, %v1379_v26  ;;  %v1526_v31 = vmul.f32 %v2016_v1, %v1494_v56  ;;  %1607 = vmatpush.msra.mxu3 %v1076_v17  ;;  %v1066_v26 = vld [vmem:[#allocation11 + $0x10] sm:$0xff]  ;;  %v1065_v1 = vld [vmem:[#allocation11 + $0x8] sm:$0xff] }
 0x568   :  { %v2020_v29 = vpop.eup %2019  ;;  %2021 = vpow2.f32 %v1441_v38  ;;  %v1525_v20 = vmul.f32 %v2018_v36, %v1493_v61 }
 0x569   :  { %2023 = vpow2.f32 %v1415_v23  ;;  %v1512_v53 = vmul.f32 %v2020_v29, %v1480_v47  ;;  %1573 = vmatpush.msra.mxu2 %v1526_v31  ;;  %1608 = vmatpush.msra.mxu3 %v1075_v34 }
 0x56a   :  { %2025 = vpow2.f32 %v1413_v21 }
 0x56b   :  { %1551 = vmatpush.msra.mxu1 %v1512_v53  ;;  %1574 = vmatpush.msra.mxu2 %v1525_v20  ;;  %v1316_v28 = vpop.xlane.xlu2 %1315  ;;  %v1314_v25 = vpop.xlane.xlu0 %1313  ;;  %v1966_v20 = vld [vmem:[%s3067_s9] ss:$0 sm:$0xff] }
 0x56c   :  { %v1378_v62 = vsub.f32 %v3241_v33, %v1316_v28  ;;  %v1377_v3 = vsub.f32 %v3242_v39, %v1314_v25  ;;  %1609 = vmatpush.msra.mxu3 %v1074_v46 }
 0x56e   :  { %v2022_v4 = vpop.eup %2021  ;;  %v1411_v43 = vmul.f32 1.442695, %v1378_v62  ;;  %v1409_v58 = vmul.f32 1.442695, %v1377_v3  ;;  %1610 = vmatpush.msra.mxu3 %v1073_v60 }
 0x56f   :  { %v2024_v7 = vpop.eup %2023  ;;  %v1524_v44 = vmul.f32 %v2022_v4, %v1492_v24 }
 0x570   :  { %v2026_v59 = vpop.eup %2025  ;;  %2027 = vpow2.f32 %v1411_v43  ;;  %v1511_v48 = vmul.f32 %v2024_v7, %v1479_v41  ;;  %1611 = vmatpush.msra.mxu3 %v1072_v16 }
 0x571   :  { %2029 = vpow2.f32 %v1409_v58  ;;  %1575 = vmatpush.msra.mxu2 %v1524_v44  ;;  %v1510_v35 = vmul.f32 %v2026_v59, %v1478_v11 }
 0x572   :  { %1552 = vmatpush.msra.mxu1 %v1511_v48  ;;  %1576 = vmatmul.f32.vlgmr.msra.gmra.mxu2 %v1030_v2 }
 0x573   :  { %1612 = vmatpush.msra.mxu3 %v1071_v6 }
 0x574   :  { %1553 = vmatpush.msra.mxu1 %v1510_v35 }
 0x575   :  { %1613 = vmatpush.msra.mxu3 %v1070_v32 }
 0x576   :  { %v2028_v55 = vpop.eup %2027 }
 0x577   :  { %v2030_v51 = vpop.eup %2029  ;;  %v1509_v54 = vmul.f32 %v2028_v55, %v1477_v19  ;;  %1614 = vmatpush.msra.mxu3 %v1069_v8 }
 0x578   :  { %v1508_v27 = vmul.f32 %v2030_v51, %v1476_v0 }
 0x579   :  { %1554 = vmatpush.msra.mxu1 %v1509_v54  ;;  %1615 = vmatpush.msra.mxu3 %v1068_v49 }
 0x57b   :  { %1555 = vmatpush.msra.mxu1 %v1508_v27  ;;  %1616 = vmatpush.msra.mxu3 %v1067_v50 }
 0x57c   :  { %1556 = vmatmul.f32.vlgmr.msra.gmra.mxu1 %v1029_v40 }
 0x57d   :  { %1617 = vmatpush.msra.mxu3 %v1066_v26 }
 0x57f   :  { %1618 = vmatpush.msra.mxu3 %v1065_v1 }
 0x581   :  { %1619 = vmatpush.msra.mxu3 %v1064_v9 }
 0x5f5   :  { %v1577_v14 = vpop.f32.mrf.mxu2 }
 0x5f9   :  { %v1557_v15 = vpop.f32.mrf.mxu1 }
 0x5fa   :  { %v1578_v22 = vadd.f32 %v1577_v14, %v1557_v15 }
 0x5fc   :  { %v1580_v30 = vmax.f32 %v1578_v22, 1e-30 }
 0x5fe   :  { %1583 = vperm.xlu1 %1961, %v1580_v30  }
 0x670   :  { %v1584_v56 = vpop.permute.xlu1 %1583 }
 0x671   :  { %2031 = vrcp.f32 %v1584_v56  ;;  %v1597_v21 = vand.u32 2147483648, %v1584_v56  ;;  %v1595_v29 = vand.u32 2147483647, %v1584_v56  ;;  %vm1591_vm2 = vweird.f32 %v1584_v56 }
 0x673   :  { %v1598_v47 = vor.u32 1.1754944e-38, %v1597_v21  ;;  %vm1596_vm4 = vcmp.eq.f32.partialorder %v1595_v29, 8.507059e+37 }
 0x677   :  { %v2032_v38 = vpop.eup %2031 }
 0x678   :  { %v1587_v23 = vmul.f32 %v2032_v38, %v1584_v56  ;;  %vm1592_vm1 = vweird.f32 %v2032_v38 }
 0x679   :  { %vm1593_vm3 = vmor %vm1591_vm2, %vm1592_vm1 }
 0x67a   :  { %v1588_v36 = vsub.f32 1.0, %v1587_v23 }
 0x67c   :  { %v1589_v31 = vmul.f32 %v2032_v38, %v1588_v36 }
 0x67e   :  { %v1590_v12 = vadd.f32 %v2032_v38, %v1589_v31 }
 0x680   :  { %v1594_v13 = vsel %vm1593_vm3, %v2032_v38, %v1590_v12 }
 0x681   :  { %v1599_v61 = vsel %vm1596_vm4, %v1598_v47, %v1594_v13 }
 0x682   :  { %v1600_v53 = vmul.f32 %v1599_v61, %v1578_v22 }
 0x684   :  { %1620 = vmatmul.f32.vlgmr.msra.gmra.mxu3 %v1600_v53 }
 0x707   :  { %v1621_v28 = vpop.f32.mrf.mxu3 }
 0x708   :  { %v1622_v25 = vadd.f32 %v1966_v20, %v1621_v28 }
 0x70a   :  { %1624 = vst [vmem:[#allocation13] sm:$0xff] %v1622_v25 }
 0x70b   :  { %1635 = dma.vmem_to_hbm [thread:$0]  %s1631_s27, 128, %s1633_s29, [#allocation4]  }
 0x70c   :  { %2209 = dma.done.wait [#allocation4], 128  }
 0x70d   :  { %2210 = vsyncadd [#allocation4], 4294967168 }
 0x70e   :  { %1640 = vsyncpa [#allocation3], 1 }
 0x70f   :  { %1641 = vsyncpa [#allocation6], 1 }
 0x710   :  { %1642 = vsyncpa [#allocation9], 1 }
 0x711   :  { %1643 = vsyncpa [#allocation12], 1 }
 0x712   :  { %1644 = vsyncpa [#allocation4], 1 }

</bundles_post_ra>
